<compile_context>
chip_gen: v5e
topology: v5e:2x2
jax: 0.10.0
libtpu: 0.0.40
codegen_flags: <defaults>
</compile_context>

<pallas_src>
import jax
import jax.numpy as jnp
from jax.experimental import pallas as pl
from jax.experimental.pallas import tpu as pltpu


# ----------------------------------------------------------------------------
# Pallas kernel: one chunk of Tc timesteps of the GRU recurrence.
# Grid = (T // Tc,), sequential; hidden state carried in VMEM scratch.
#   x_ref : (Tc, B, E)  bf16     wi_ref: (E, 3H) bf16     wh_ref: (H, 3H) bf16
#   b_ref : (2, 1, 3H)  f32  rows = [concat(b_ir,b_iz,b_in), concat(b_hr,b_hz,b_hn)]
#   out   : (Tc, B, H)  f32      hT  : (B, H) f32         h_scr : (B, H) f32
# ----------------------------------------------------------------------------
def gru_kernel(x_ref, h0_ref, wi_ref, wh_ref, b_ref, out_ref, hT_ref, h_scr):
    c = pl.program_id(0)
    Tc, Bp, E = x_ref.shape
    H = h_scr.shape[-1]

    @pl.when(c == 0)
    def _():
        h_scr[...] = h0_ref[...]

    wi = wi_ref[...]               # (E, 3H) bf16
    wh = wh_ref[...]               # (H, 3H) bf16
    b_i = b_ref[0]                 # (1, 3H) f32, broadcasts over batch
    b_h = b_ref[1]                 # (1, 3H) f32

    # Input projection for the whole chunk: x does not depend on the recurrent
    # state, so do it as one big MXU matmul (Tc*Bp rows) instead of Tc tiny ones.
    x_all = x_ref[...].reshape(Tc * Bp, E)                               # bf16
    gi_all = (jnp.dot(x_all, wi, preferred_element_type=jnp.float32)
              + b_i).reshape(Tc, Bp, 3 * H)                              # f32

    h = h_scr[...]                 # (Bp, H) f32 running hidden state

    # Fully unrolled chunk loop (Tc is a static Python int).
    for i in range(Tc):
        gi = gi_all[i]                                                   # (Bp, 3H)
        gh = jnp.dot(h.astype(wh.dtype), wh,
                     preferred_element_type=jnp.float32) + b_h           # (Bp, 3H)
        # PyTorch GRU cell, gate order [r, z, n]; static 128-lane slices.
        r = jax.nn.sigmoid(gi[:, 0:H] + gh[:, 0:H])
        z = jax.nn.sigmoid(gi[:, H:2 * H] + gh[:, H:2 * H])
        n = jnp.tanh(gi[:, 2 * H:3 * H] + r * gh[:, 2 * H:3 * H])
        h = (1.0 - z) * n + z * h
        out_ref[i] = h.astype(out_ref.dtype)

    h_scr[...] = h

    @pl.when(c == pl.num_programs(0) - 1)
    def _():
        hT_ref[...] = h            # write the final-hidden block once


def _pick_chunk(T, max_chunk=16):
    for cand in range(min(T, max_chunk), 0, -1):
        if T % cand == 0:
            return cand
    return 1


# ----------------------------------------------------------------------------
# GRU.forward: inputs (B, T, E) f32, hidden_states (1, B, H) f32
#           -> (outputs (B, T, H) f32, hidden (1, B, H) f32)
# ----------------------------------------------------------------------------
def gru_forward_impl(inputs, hidden_states, params):
    B, T, E = inputs.shape
    H = hidden_states.shape[-1]
    Bp = max(8, ((B + 7) // 8) * 8)     # pad batch to full sublane tiles
    Tc = _pick_chunk(T)

    x_tbe = jnp.transpose(inputs, (1, 0, 2)).astype(jnp.bfloat16)   # (T, B, E)
    h0 = hidden_states[0].astype(jnp.float32)                       # (B, H)
    if Bp != B:
        x_tbe = jnp.pad(x_tbe, ((0, 0), (0, Bp - B), (0, 0)))
        h0 = jnp.pad(h0, ((0, Bp - B), (0, 0)))

    out, hT = pl.pallas_call(
        gru_kernel,
        out_shape=(jax.ShapeDtypeStruct((T, Bp, H), jnp.float32),
                   jax.ShapeDtypeStruct((Bp, H), jnp.float32)),
        grid_spec=pltpu.PrefetchScalarGridSpec(
            num_scalar_prefetch=0,
            grid=(T // Tc,),
            in_specs=[
                pl.BlockSpec((Tc, Bp, E), lambda c: (c, 0, 0)),      # x chunk
                pl.BlockSpec((Bp, H), lambda c: (0, 0)),             # h0
                pl.BlockSpec((E, 3 * H), lambda c: (0, 0)),          # Wi fused
                pl.BlockSpec((H, 3 * H), lambda c: (0, 0)),          # Wh fused
                pl.BlockSpec((2, 1, 3 * H), lambda c: (0, 0, 0)),    # biases
            ],
            out_specs=(
                pl.BlockSpec((Tc, Bp, H), lambda c: (c, 0, 0)),      # outputs
                pl.BlockSpec((Bp, H), lambda c: (0, 0)),             # final h
            ),
            scratch_shapes=[pltpu.VMEM((Bp, H), jnp.float32)],
        ),
        compiler_params=pltpu.CompilerParams(
            dimension_semantics=("arbitrary",)),
    )(x_tbe, h0, params["wi"], params["wh"], params["b"])

    outputs = jnp.transpose(out[:, :B, :], (1, 0, 2))    # (B, T, H)
    hidden = hT[:B][None]                                # (1, B, H)
    return outputs, hidden


gru_forward = jax.jit(gru_forward_impl)


# ----------------------------------------------------------------------------
# Pure-JAX reference (same math: bf16 matmul inputs, f32 accumulation).
# ----------------------------------------------------------------------------
def gru_ref(inputs, hidden_states, params):
    wi, wh, b = params["wi"], params["wh"], params["b"]
    H = hidden_states.shape[-1]
    b_i, b_h = b[0], b[1]

    def step(h, x):
        gi = jnp.dot(x.astype(jnp.bfloat16), wi,
                     preferred_element_type=jnp.float32) + b_i
        gh = jnp.dot(h.astype(jnp.bfloat16), wh,
                     preferred_element_type=jnp.float32) + b_h
        r = jax.nn.sigmoid(gi[:, 0:H] + gh[:, 0:H])
        z = jax.nn.sigmoid(gi[:, H:2 * H] + gh[:, H:2 * H])
        n = jnp.tanh(gi[:, 2 * H:3 * H] + r * gh[:, 2 * H:3 * H])
        h_new = (1.0 - z) * n + z * h
        return h_new, h_new

    x_tbe = jnp.transpose(inputs, (1, 0, 2)).astype(jnp.float32)
    hT, ys = jax.lax.scan(step, hidden_states[0].astype(jnp.float32), x_tbe)
    return jnp.transpose(ys, (1, 0, 2)), hT[None]


# ----------------------------------------------------------------------------
# Deterministic parameter init (PyTorch-style uniform(-1/sqrt(H), +1/sqrt(H))),
# packed into the fused [r, z, n] layout used by the kernel.
# ----------------------------------------------------------------------------
def init_params(key, input_size, hidden_size):
    ks = jax.random.split(key, 12)
    scale = (1.0 / hidden_size) ** 0.5

    def u(k, shape):
        return jax.random.uniform(k, shape, jnp.float32, -scale, scale)

    # PyTorch weights are (H, in); transpose for x @ W form, concat on lanes.
    w_ir, w_iz, w_in = (u(ks[i], (hidden_size, input_size)) for i in range(3))
    w_hr, w_hz, w_hn = (u(ks[i + 3], (hidden_size, hidden_size)) for i in range(3))
    b_ir, b_iz, b_in_, b_hr, b_hz, b_hn = (
        u(ks[i + 6], (hidden_size,)) for i in range(6))

    wi = jnp.concatenate([w_ir.T, w_iz.T, w_in.T], axis=1).astype(jnp.bfloat16)
    wh = jnp.concatenate([w_hr.T, w_hz.T, w_hn.T], axis=1).astype(jnp.bfloat16)
    b_i = jnp.concatenate([b_ir, b_iz, b_in_])[None, :]          # (1, 3H)
    b_h = jnp.concatenate([b_hr, b_hz, b_hn])[None, :]           # (1, 3H)
    b = jnp.stack([b_i, b_h]).astype(jnp.float32)                # (2, 1, 3H)
    return dict(wi=wi, wh=wh, b=b)


if __name__ == "__main__":
    # Small shapes consistent with the module (input_size == hidden_size).
    E = H = 128
    B, T = 4, 8

    key = jax.random.PRNGKey(0)
    k_par, k_x, k_h = jax.random.split(key, 3)
    params = init_params(k_par, E, H)

    inputs = jax.random.normal(k_x, (B, T, E), jnp.float32)
    hidden0 = jax.random.normal(k_h, (1, B, H), jnp.float32) * 0.1

    outputs, hidden = gru_forward(inputs, hidden0, params)
    jax.block_until_ready((outputs, hidden))

    ref_out, ref_hid = gru_ref(inputs, hidden0, params)
    assert outputs.shape == (B, T, H) and hidden.shape == (1, B, H)
    assert jnp.allclose(outputs, ref_out, atol=1e-3, rtol=1e-3)
    assert jnp.allclose(hidden, ref_hid, atol=1e-3, rtol=1e-3)

    print("KERNEL_OK")
</pallas_src>

<mosaic_0001>
module attributes {stable_mosaic.version = 11 : i64} {
  func.func @gru_kernel(%arg0: i32, %arg1: memref<8x8x128xbf16, #tpu.memory_space<vmem>>, %arg2: memref<8x128xf32, #tpu.memory_space<vmem>>, %arg3: memref<128x384xbf16, #tpu.memory_space<vmem>>, %arg4: memref<128x384xbf16, #tpu.memory_space<vmem>>, %arg5: memref<2x1x384xf32, #tpu.memory_space<vmem>>, %arg6: memref<8x8x128xf32, #tpu.memory_space<vmem>>, %arg7: memref<8x128xf32, #tpu.memory_space<vmem>>, %arg8: memref<8x128xf32, #tpu.memory_space<vmem>>) attributes {dimension_semantics = [#tpu.dimension_semantics<arbitrary>], iteration_bounds = array<i64: 1>, scalar_prefetch = 0 : i64, scratch_operands = 1 : i64, tpu.core_type = #tpu.core_type<tc>, window_params = [{transform_indices = @transform_0, window_bounds = array<i64: 8, 8, 128>}, {pipeline_mode = #tpu.pipeline_mode<synchronous>, transform_indices = @transform_1, window_bounds = array<i64: 8, 128>}, {pipeline_mode = #tpu.pipeline_mode<synchronous>, transform_indices = @transform_2, window_bounds = array<i64: 128, 384>}, {pipeline_mode = #tpu.pipeline_mode<synchronous>, transform_indices = @transform_3, window_bounds = array<i64: 128, 384>}, {pipeline_mode = #tpu.pipeline_mode<synchronous>, transform_indices = @transform_4, window_bounds = array<i64: 2, 1, 384>}, {transform_indices = @transform_5, window_bounds = array<i64: 8, 8, 128>}, {pipeline_mode = #tpu.pipeline_mode<synchronous>, transform_indices = @transform_6, window_bounds = array<i64: 8, 128>}]} {
    %c0_i32 = arith.constant 0 : i32
    %0 = arith.cmpi eq, %arg0, %c0_i32 : i32
    %1 = arith.extui %0 : i1 to i32
    %c0_i32_0 = arith.constant 0 : i32
    %2 = arith.cmpi ne, %1, %c0_i32_0 : i32
    scf.if %2 {
      %c0_68 = arith.constant 0 : index
      %c0_69 = arith.constant 0 : index
      %300 = vector.load %arg2[%c0_68, %c0_69] : memref<8x128xf32, #tpu.memory_space<vmem>>, vector<8x128xf32>
      %c0_70 = arith.constant 0 : index
      %c0_71 = arith.constant 0 : index
      %301 = vector.load %arg8[%c0_70, %c0_71] : memref<8x128xf32, #tpu.memory_space<vmem>>, vector<8x128xf32>
      tpu.vector_store %arg8[%c0_70, %c0_71], %300 {strides = array<i32>} : memref<8x128xf32, #tpu.memory_space<vmem>>, vector<8x128xf32>,
    } else {
    }
    %c0 = arith.constant 0 : index
    %c0_1 = arith.constant 0 : index
    %3 = vector.load %arg3[%c0, %c0_1] : memref<128x384xbf16, #tpu.memory_space<vmem>>, vector<128x384xbf16>
    %c0_2 = arith.constant 0 : index
    %c0_3 = arith.constant 0 : index
    %4 = vector.load %arg4[%c0_2, %c0_3] : memref<128x384xbf16, #tpu.memory_space<vmem>>, vector<128x384xbf16>
    %c0_4 = arith.constant 0 : index
    %c0_5 = arith.constant 0 : index
    %c0_6 = arith.constant 0 : index
    %5 = vector.load %arg5[%c0_4, %c0_5, %c0_6] : memref<2x1x384xf32, #tpu.memory_space<vmem>>, vector<1x1x384xf32>
    %6 = vector.shape_cast %5 : vector<1x1x384xf32> to vector<1x384xf32>
    %c1 = arith.constant 1 : index
    %c0_7 = arith.constant 0 : index
    %c0_8 = arith.constant 0 : index
    %7 = vector.load %arg5[%c1, %c0_7, %c0_8] : memref<2x1x384xf32, #tpu.memory_space<vmem>>, vector<1x1x384xf32>
    %8 = vector.shape_cast %7 : vector<1x1x384xf32> to vector<1x384xf32>
    %c0_9 = arith.constant 0 : index
    %c0_10 = arith.constant 0 : index
    %c0_11 = arith.constant 0 : index
    %9 = vector.load %arg1[%c0_9, %c0_10, %c0_11] : memref<8x8x128xbf16, #tpu.memory_space<vmem>>, vector<8x8x128xbf16>
    %10 = vector.shape_cast %9 : vector<8x8x128xbf16> to vector<64x128xbf16>
    %cst = arith.constant dense<0.000000e+00> : vector<64x384xf32>
    %11 = tpu.matmul %10, %3, %cst {dimension_numbers = #tpu.dot_dimension_numbers<[1], [0], [0], [1], [0, 0, 1, 1], [], []>} : vector<64x128xbf16>, vector<128x384xbf16>, vector<64x384xf32> -> vector<64x384xf32>
    %12 = vector.broadcast %6 : vector<1x384xf32> to vector<64x384xf32>
    %13 = arith.addf %11, %12 : vector<64x384xf32>
    %14 = vector.shape_cast %13 : vector<64x384xf32> to vector<8x8x384xf32>
    %c0_12 = arith.constant 0 : index
    %c0_13 = arith.constant 0 : index
    %15 = vector.load %arg8[%c0_12, %c0_13] : memref<8x128xf32, #tpu.memory_space<vmem>>, vector<8x128xf32>
    %16 = vector.extract_strided_slice %14 {offsets = [0, 0, 0], sizes = [1, 8, 384], strides = [1, 1, 1]} : vector<8x8x384xf32> to vector<1x8x384xf32>
    %17 = vector.shape_cast %16 : vector<1x8x384xf32> to vector<8x384xf32>
    %18 = arith.truncf %15 : vector<8x128xf32> to vector<8x128xbf16>
    %cst_14 = arith.constant dense<0.000000e+00> : vector<8x384xf32>
    %19 = tpu.matmul %18, %4, %cst_14 {dimension_numbers = #tpu.dot_dimension_numbers<[1], [0], [0], [1], [0, 0, 1, 1], [], []>} : vector<8x128xbf16>, vector<128x384xbf16>, vector<8x384xf32> -> vector<8x384xf32>
    %20 = vector.broadcast %8 : vector<1x384xf32> to vector<8x384xf32>
    %21 = arith.addf %19, %20 : vector<8x384xf32>
    %22 = vector.extract_strided_slice %17 {offsets = [0, 0], sizes = [8, 128], strides = [1, 1]} : vector<8x384xf32> to vector<8x128xf32>
    %23 = vector.extract_strided_slice %21 {offsets = [0, 0], sizes = [8, 128], strides = [1, 1]} : vector<8x384xf32> to vector<8x128xf32>
    %24 = arith.addf %22, %23 : vector<8x128xf32>
    %25 = arith.negf %24 : vector<8x128xf32>
    %26 = math.exp %25 : vector<8x128xf32>
    %cst_15 = arith.constant 1.000000e+00 : f32
    %27 = vector.broadcast %cst_15 : f32 to vector<8x128xf32>
    %28 = arith.addf %27, %26 : vector<8x128xf32>
    %29 = arith.divf %27, %28 : vector<8x128xf32>
    %30 = vector.extract_strided_slice %17 {offsets = [0, 128], sizes = [8, 128], strides = [1, 1]} : vector<8x384xf32> to vector<8x128xf32>
    %31 = vector.extract_strided_slice %21 {offsets = [0, 128], sizes = [8, 128], strides = [1, 1]} : vector<8x384xf32> to vector<8x128xf32>
    %32 = arith.addf %30, %31 : vector<8x128xf32>
    %33 = arith.negf %32 : vector<8x128xf32>
    %34 = math.exp %33 : vector<8x128xf32>
    %cst_16 = arith.constant 1.000000e+00 : f32
    %35 = vector.broadcast %cst_16 : f32 to vector<8x128xf32>
    %36 = arith.addf %35, %34 : vector<8x128xf32>
    %37 = arith.divf %35, %36 : vector<8x128xf32>
    %38 = vector.extract_strided_slice %17 {offsets = [0, 256], sizes = [8, 128], strides = [1, 1]} : vector<8x384xf32> to vector<8x128xf32>
    %39 = vector.extract_strided_slice %21 {offsets = [0, 256], sizes = [8, 128], strides = [1, 1]} : vector<8x384xf32> to vector<8x128xf32>
    %40 = arith.mulf %29, %39 : vector<8x128xf32>
    %41 = arith.addf %38, %40 : vector<8x128xf32>
    %42 = math.tanh %41 : vector<8x128xf32>
    %cst_17 = arith.constant 1.000000e+00 : f32
    %43 = vector.broadcast %cst_17 : f32 to vector<8x128xf32>
    %44 = arith.subf %43, %37 : vector<8x128xf32>
    %45 = arith.mulf %44, %42 : vector<8x128xf32>
    %46 = arith.mulf %37, %15 : vector<8x128xf32>
    %47 = arith.addf %45, %46 : vector<8x128xf32>
    %c0_18 = arith.constant 0 : index
    %c0_19 = arith.constant 0 : index
    %c0_20 = arith.constant 0 : index
    %48 = vector.load %arg6[%c0_18, %c0_19, %c0_20] : memref<8x8x128xf32, #tpu.memory_space<vmem>>, vector<1x8x128xf32>
    %49 = vector.shape_cast %48 : vector<1x8x128xf32> to vector<8x128xf32>
    %50 = vector.shape_cast %47 : vector<8x128xf32> to vector<1x8x128xf32>
    tpu.vector_store %arg6[%c0_18, %c0_19, %c0_20], %50 {strides = array<i32>} : memref<8x8x128xf32, #tpu.memory_space<vmem>>, vector<1x8x128xf32>,
    %51 = vector.extract_strided_slice %14 {offsets = [1, 0, 0], sizes = [1, 8, 384], strides = [1, 1, 1]} : vector<8x8x384xf32> to vector<1x8x384xf32>
    %52 = vector.shape_cast %51 : vector<1x8x384xf32> to vector<8x384xf32>
    %53 = arith.truncf %47 : vector<8x128xf32> to vector<8x128xbf16>
    %cst_21 = arith.constant dense<0.000000e+00> : vector<8x384xf32>
    %54 = tpu.matmul %53, %4, %cst_21 {dimension_numbers = #tpu.dot_dimension_numbers<[1], [0], [0], [1], [0, 0, 1, 1], [], []>} : vector<8x128xbf16>, vector<128x384xbf16>, vector<8x384xf32> -> vector<8x384xf32>
    %55 = vector.broadcast %8 : vector<1x384xf32> to vector<8x384xf32>
    %56 = arith.addf %54, %55 : vector<8x384xf32>
    %57 = vector.extract_strided_slice %52 {offsets = [0, 0], sizes = [8, 128], strides = [1, 1]} : vector<8x384xf32> to vector<8x128xf32>
    %58 = vector.extract_strided_slice %56 {offsets = [0, 0], sizes = [8, 128], strides = [1, 1]} : vector<8x384xf32> to vector<8x128xf32>
    %59 = arith.addf %57, %58 : vector<8x128xf32>
    %60 = arith.negf %59 : vector<8x128xf32>
    %61 = math.exp %60 : vector<8x128xf32>
    %cst_22 = arith.constant 1.000000e+00 : f32
    %62 = vector.broadcast %cst_22 : f32 to vector<8x128xf32>
    %63 = arith.addf %62, %61 : vector<8x128xf32>
    %64 = arith.divf %62, %63 : vector<8x128xf32>
    %65 = vector.extract_strided_slice %52 {offsets = [0, 128], sizes = [8, 128], strides = [1, 1]} : vector<8x384xf32> to vector<8x128xf32>
    %66 = vector.extract_strided_slice %56 {offsets = [0, 128], sizes = [8, 128], strides = [1, 1]} : vector<8x384xf32> to vector<8x128xf32>
    %67 = arith.addf %65, %66 : vector<8x128xf32>
    %68 = arith.negf %67 : vector<8x128xf32>
    %69 = math.exp %68 : vector<8x128xf32>
    %cst_23 = arith.constant 1.000000e+00 : f32
    %70 = vector.broadcast %cst_23 : f32 to vector<8x128xf32>
    %71 = arith.addf %70, %69 : vector<8x128xf32>
    %72 = arith.divf %70, %71 : vector<8x128xf32>
    %73 = vector.extract_strided_slice %52 {offsets = [0, 256], sizes = [8, 128], strides = [1, 1]} : vector<8x384xf32> to vector<8x128xf32>
    %74 = vector.extract_strided_slice %56 {offsets = [0, 256], sizes = [8, 128], strides = [1, 1]} : vector<8x384xf32> to vector<8x128xf32>
    %75 = arith.mulf %64, %74 : vector<8x128xf32>
    %76 = arith.addf %73, %75 : vector<8x128xf32>
    %77 = math.tanh %76 : vector<8x128xf32>
    %cst_24 = arith.constant 1.000000e+00 : f32
    %78 = vector.broadcast %cst_24 : f32 to vector<8x128xf32>
    %79 = arith.subf %78, %72 : vector<8x128xf32>
    %80 = arith.mulf %79, %77 : vector<8x128xf32>
    %81 = arith.mulf %72, %47 : vector<8x128xf32>
    %82 = arith.addf %80, %81 : vector<8x128xf32>
    %c1_25 = arith.constant 1 : index
    %c0_26 = arith.constant 0 : index
    %c0_27 = arith.constant 0 : index
    %83 = vector.load %arg6[%c1_25, %c0_26, %c0_27] : memref<8x8x128xf32, #tpu.memory_space<vmem>>, vector<1x8x128xf32>
    %84 = vector.shape_cast %83 : vector<1x8x128xf32> to vector<8x128xf32>
    %85 = vector.shape_cast %82 : vector<8x128xf32> to vector<1x8x128xf32>
    tpu.vector_store %arg6[%c1_25, %c0_26, %c0_27], %85 {strides = array<i32>} : memref<8x8x128xf32, #tpu.memory_space<vmem>>, vector<1x8x128xf32>,
    %86 = vector.extract_strided_slice %14 {offsets = [2, 0, 0], sizes = [1, 8, 384], strides = [1, 1, 1]} : vector<8x8x384xf32> to vector<1x8x384xf32>
    %87 = vector.shape_cast %86 : vector<1x8x384xf32> to vector<8x384xf32>
    %88 = arith.truncf %82 : vector<8x128xf32> to vector<8x128xbf16>
    %cst_28 = arith.constant dense<0.000000e+00> : vector<8x384xf32>
    %89 = tpu.matmul %88, %4, %cst_28 {dimension_numbers = #tpu.dot_dimension_numbers<[1], [0], [0], [1], [0, 0, 1, 1], [], []>} : vector<8x128xbf16>, vector<128x384xbf16>, vector<8x384xf32> -> vector<8x384xf32>
    %90 = vector.broadcast %8 : vector<1x384xf32> to vector<8x384xf32>
    %91 = arith.addf %89, %90 : vector<8x384xf32>
    %92 = vector.extract_strided_slice %87 {offsets = [0, 0], sizes = [8, 128], strides = [1, 1]} : vector<8x384xf32> to vector<8x128xf32>
    %93 = vector.extract_strided_slice %91 {offsets = [0, 0], sizes = [8, 128], strides = [1, 1]} : vector<8x384xf32> to vector<8x128xf32>
    %94 = arith.addf %92, %93 : vector<8x128xf32>
    %95 = arith.negf %94 : vector<8x128xf32>
    %96 = math.exp %95 : vector<8x128xf32>
    %cst_29 = arith.constant 1.000000e+00 : f32
    %97 = vector.broadcast %cst_29 : f32 to vector<8x128xf32>
    %98 = arith.addf %97, %96 : vector<8x128xf32>
    %99 = arith.divf %97, %98 : vector<8x128xf32>
    %100 = vector.extract_strided_slice %87 {offsets = [0, 128], sizes = [8, 128], strides = [1, 1]} : vector<8x384xf32> to vector<8x128xf32>
    %101 = vector.extract_strided_slice %91 {offsets = [0, 128], sizes = [8, 128], strides = [1, 1]} : vector<8x384xf32> to vector<8x128xf32>
    %102 = arith.addf %100, %101 : vector<8x128xf32>
    %103 = arith.negf %102 : vector<8x128xf32>
    %104 = math.exp %103 : vector<8x128xf32>
    %cst_30 = arith.constant 1.000000e+00 : f32
    %105 = vector.broadcast %cst_30 : f32 to vector<8x128xf32>
    %106 = arith.addf %105, %104 : vector<8x128xf32>
    %107 = arith.divf %105, %106 : vector<8x128xf32>
    %108 = vector.extract_strided_slice %87 {offsets = [0, 256], sizes = [8, 128], strides = [1, 1]} : vector<8x384xf32> to vector<8x128xf32>
    %109 = vector.extract_strided_slice %91 {offsets = [0, 256], sizes = [8, 128], strides = [1, 1]} : vector<8x384xf32> to vector<8x128xf32>
    %110 = arith.mulf %99, %109 : vector<8x128xf32>
    %111 = arith.addf %108, %110 : vector<8x128xf32>
    %112 = math.tanh %111 : vector<8x128xf32>
    %cst_31 = arith.constant 1.000000e+00 : f32
    %113 = vector.broadcast %cst_31 : f32 to vector<8x128xf32>
    %114 = arith.subf %113, %107 : vector<8x128xf32>
    %115 = arith.mulf %114, %112 : vector<8x128xf32>
    %116 = arith.mulf %107, %82 : vector<8x128xf32>
    %117 = arith.addf %115, %116 : vector<8x128xf32>
    %c2 = arith.constant 2 : index
    %c0_32 = arith.constant 0 : index
    %c0_33 = arith.constant 0 : index
    %118 = vector.load %arg6[%c2, %c0_32, %c0_33] : memref<8x8x128xf32, #tpu.memory_space<vmem>>, vector<1x8x128xf32>
    %119 = vector.shape_cast %118 : vector<1x8x128xf32> to vector<8x128xf32>
    %120 = vector.shape_cast %117 : vector<8x128xf32> to vector<1x8x128xf32>
    tpu.vector_store %arg6[%c2, %c0_32, %c0_33], %120 {strides = array<i32>} : memref<8x8x128xf32, #tpu.memory_space<vmem>>, vector<1x8x128xf32>,
    %121 = vector.extract_strided_slice %14 {offsets = [3, 0, 0], sizes = [1, 8, 384], strides = [1, 1, 1]} : vector<8x8x384xf32> to vector<1x8x384xf32>
    %122 = vector.shape_cast %121 : vector<1x8x384xf32> to vector<8x384xf32>
    %123 = arith.truncf %117 : vector<8x128xf32> to vector<8x128xbf16>
    %cst_34 = arith.constant dense<0.000000e+00> : vector<8x384xf32>
    %124 = tpu.matmul %123, %4, %cst_34 {dimension_numbers = #tpu.dot_dimension_numbers<[1], [0], [0], [1], [0, 0, 1, 1], [], []>} : vector<8x128xbf16>, vector<128x384xbf16>, vector<8x384xf32> -> vector<8x384xf32>
    %125 = vector.broadcast %8 : vector<1x384xf32> to vector<8x384xf32>
    %126 = arith.addf %124, %125 : vector<8x384xf32>
    %127 = vector.extract_strided_slice %122 {offsets = [0, 0], sizes = [8, 128], strides = [1, 1]} : vector<8x384xf32> to vector<8x128xf32>
    %128 = vector.extract_strided_slice %126 {offsets = [0, 0], sizes = [8, 128], strides = [1, 1]} : vector<8x384xf32> to vector<8x128xf32>
    %129 = arith.addf %127, %128 : vector<8x128xf32>
    %130 = arith.negf %129 : vector<8x128xf32>
    %131 = math.exp %130 : vector<8x128xf32>
    %cst_35 = arith.constant 1.000000e+00 : f32
    %132 = vector.broadcast %cst_35 : f32 to vector<8x128xf32>
    %133 = arith.addf %132, %131 : vector<8x128xf32>
    %134 = arith.divf %132, %133 : vector<8x128xf32>
    %135 = vector.extract_strided_slice %122 {offsets = [0, 128], sizes = [8, 128], strides = [1, 1]} : vector<8x384xf32> to vector<8x128xf32>
    %136 = vector.extract_strided_slice %126 {offsets = [0, 128], sizes = [8, 128], strides = [1, 1]} : vector<8x384xf32> to vector<8x128xf32>
    %137 = arith.addf %135, %136 : vector<8x128xf32>
    %138 = arith.negf %137 : vector<8x128xf32>
    %139 = math.exp %138 : vector<8x128xf32>
    %cst_36 = arith.constant 1.000000e+00 : f32
    %140 = vector.broadcast %cst_36 : f32 to vector<8x128xf32>
    %141 = arith.addf %140, %139 : vector<8x128xf32>
    %142 = arith.divf %140, %141 : vector<8x128xf32>
    %143 = vector.extract_strided_slice %122 {offsets = [0, 256], sizes = [8, 128], strides = [1, 1]} : vector<8x384xf32> to vector<8x128xf32>
    %144 = vector.extract_strided_slice %126 {offsets = [0, 256], sizes = [8, 128], strides = [1, 1]} : vector<8x384xf32> to vector<8x128xf32>
    %145 = arith.mulf %134, %144 : vector<8x128xf32>
    %146 = arith.addf %143, %145 : vector<8x128xf32>
    %147 = math.tanh %146 : vector<8x128xf32>
    %cst_37 = arith.constant 1.000000e+00 : f32
    %148 = vector.broadcast %cst_37 : f32 to vector<8x128xf32>
    %149 = arith.subf %148, %142 : vector<8x128xf32>
    %150 = arith.mulf %149, %147 : vector<8x128xf32>
    %151 = arith.mulf %142, %117 : vector<8x128xf32>
    %152 = arith.addf %150, %151 : vector<8x128xf32>
    %c3 = arith.constant 3 : index
    %c0_38 = arith.constant 0 : index
    %c0_39 = arith.constant 0 : index
    %153 = vector.load %arg6[%c3, %c0_38, %c0_39] : memref<8x8x128xf32, #tpu.memory_space<vmem>>, vector<1x8x128xf32>
    %154 = vector.shape_cast %153 : vector<1x8x128xf32> to vector<8x128xf32>
    %155 = vector.shape_cast %152 : vector<8x128xf32> to vector<1x8x128xf32>
    tpu.vector_store %arg6[%c3, %c0_38, %c0_39], %155 {strides = array<i32>} : memref<8x8x128xf32, #tpu.memory_space<vmem>>, vector<1x8x128xf32>,
    %156 = vector.extract_strided_slice %14 {offsets = [4, 0, 0], sizes = [1, 8, 384], strides = [1, 1, 1]} : vector<8x8x384xf32> to vector<1x8x384xf32>
    %157 = vector.shape_cast %156 : vector<1x8x384xf32> to vector<8x384xf32>
    %158 = arith.truncf %152 : vector<8x128xf32> to vector<8x128xbf16>
    %cst_40 = arith.constant dense<0.000000e+00> : vector<8x384xf32>
    %159 = tpu.matmul %158, %4, %cst_40 {dimension_numbers = #tpu.dot_dimension_numbers<[1], [0], [0], [1], [0, 0, 1, 1], [], []>} : vector<8x128xbf16>, vector<128x384xbf16>, vector<8x384xf32> -> vector<8x384xf32>
    %160 = vector.broadcast %8 : vector<1x384xf32> to vector<8x384xf32>
    %161 = arith.addf %159, %160 : vector<8x384xf32>
    %162 = vector.extract_strided_slice %157 {offsets = [0, 0], sizes = [8, 128], strides = [1, 1]} : vector<8x384xf32> to vector<8x128xf32>
    %163 = vector.extract_strided_slice %161 {offsets = [0, 0], sizes = [8, 128], strides = [1, 1]} : vector<8x384xf32> to vector<8x128xf32>
    %164 = arith.addf %162, %163 : vector<8x128xf32>
    %165 = arith.negf %164 : vector<8x128xf32>
    %166 = math.exp %165 : vector<8x128xf32>
    %cst_41 = arith.constant 1.000000e+00 : f32
    %167 = vector.broadcast %cst_41 : f32 to vector<8x128xf32>
    %168 = arith.addf %167, %166 : vector<8x128xf32>
    %169 = arith.divf %167, %168 : vector<8x128xf32>
    %170 = vector.extract_strided_slice %157 {offsets = [0, 128], sizes = [8, 128], strides = [1, 1]} : vector<8x384xf32> to vector<8x128xf32>
    %171 = vector.extract_strided_slice %161 {offsets = [0, 128], sizes = [8, 128], strides = [1, 1]} : vector<8x384xf32> to vector<8x128xf32>
    %172 = arith.addf %170, %171 : vector<8x128xf32>
    %173 = arith.negf %172 : vector<8x128xf32>
    %174 = math.exp %173 : vector<8x128xf32>
    %cst_42 = arith.constant 1.000000e+00 : f32
    %175 = vector.broadcast %cst_42 : f32 to vector<8x128xf32>
    %176 = arith.addf %175, %174 : vector<8x128xf32>
    %177 = arith.divf %175, %176 : vector<8x128xf32>
    %178 = vector.extract_strided_slice %157 {offsets = [0, 256], sizes = [8, 128], strides = [1, 1]} : vector<8x384xf32> to vector<8x128xf32>
    %179 = vector.extract_strided_slice %161 {offsets = [0, 256], sizes = [8, 128], strides = [1, 1]} : vector<8x384xf32> to vector<8x128xf32>
    %180 = arith.mulf %169, %179 : vector<8x128xf32>
    %181 = arith.addf %178, %180 : vector<8x128xf32>
    %182 = math.tanh %181 : vector<8x128xf32>
    %cst_43 = arith.constant 1.000000e+00 : f32
    %183 = vector.broadcast %cst_43 : f32 to vector<8x128xf32>
    %184 = arith.subf %183, %177 : vector<8x128xf32>
    %185 = arith.mulf %184, %182 : vector<8x128xf32>
    %186 = arith.mulf %177, %152 : vector<8x128xf32>
    %187 = arith.addf %185, %186 : vector<8x128xf32>
    %c4 = arith.constant 4 : index
    %c0_44 = arith.constant 0 : index
    %c0_45 = arith.constant 0 : index
    %188 = vector.load %arg6[%c4, %c0_44, %c0_45] : memref<8x8x128xf32, #tpu.memory_space<vmem>>, vector<1x8x128xf32>
    %189 = vector.shape_cast %188 : vector<1x8x128xf32> to vector<8x128xf32>
    %190 = vector.shape_cast %187 : vector<8x128xf32> to vector<1x8x128xf32>
    tpu.vector_store %arg6[%c4, %c0_44, %c0_45], %190 {strides = array<i32>} : memref<8x8x128xf32, #tpu.memory_space<vmem>>, vector<1x8x128xf32>,
    %191 = vector.extract_strided_slice %14 {offsets = [5, 0, 0], sizes = [1, 8, 384], strides = [1, 1, 1]} : vector<8x8x384xf32> to vector<1x8x384xf32>
    %192 = vector.shape_cast %191 : vector<1x8x384xf32> to vector<8x384xf32>
    %193 = arith.truncf %187 : vector<8x128xf32> to vector<8x128xbf16>
    %cst_46 = arith.constant dense<0.000000e+00> : vector<8x384xf32>
    %194 = tpu.matmul %193, %4, %cst_46 {dimension_numbers = #tpu.dot_dimension_numbers<[1], [0], [0], [1], [0, 0, 1, 1], [], []>} : vector<8x128xbf16>, vector<128x384xbf16>, vector<8x384xf32> -> vector<8x384xf32>
    %195 = vector.broadcast %8 : vector<1x384xf32> to vector<8x384xf32>
    %196 = arith.addf %194, %195 : vector<8x384xf32>
    %197 = vector.extract_strided_slice %192 {offsets = [0, 0], sizes = [8, 128], strides = [1, 1]} : vector<8x384xf32> to vector<8x128xf32>
    %198 = vector.extract_strided_slice %196 {offsets = [0, 0], sizes = [8, 128], strides = [1, 1]} : vector<8x384xf32> to vector<8x128xf32>
    %199 = arith.addf %197, %198 : vector<8x128xf32>
    %200 = arith.negf %199 : vector<8x128xf32>
    %201 = math.exp %200 : vector<8x128xf32>
    %cst_47 = arith.constant 1.000000e+00 : f32
    %202 = vector.broadcast %cst_47 : f32 to vector<8x128xf32>
    %203 = arith.addf %202, %201 : vector<8x128xf32>
    %204 = arith.divf %202, %203 : vector<8x128xf32>
    %205 = vector.extract_strided_slice %192 {offsets = [0, 128], sizes = [8, 128], strides = [1, 1]} : vector<8x384xf32> to vector<8x128xf32>
    %206 = vector.extract_strided_slice %196 {offsets = [0, 128], sizes = [8, 128], strides = [1, 1]} : vector<8x384xf32> to vector<8x128xf32>
    %207 = arith.addf %205, %206 : vector<8x128xf32>
    %208 = arith.negf %207 : vector<8x128xf32>
    %209 = math.exp %208 : vector<8x128xf32>
    %cst_48 = arith.constant 1.000000e+00 : f32
    %210 = vector.broadcast %cst_48 : f32 to vector<8x128xf32>
    %211 = arith.addf %210, %209 : vector<8x128xf32>
    %212 = arith.divf %210, %211 : vector<8x128xf32>
    %213 = vector.extract_strided_slice %192 {offsets = [0, 256], sizes = [8, 128], strides = [1, 1]} : vector<8x384xf32> to vector<8x128xf32>
    %214 = vector.extract_strided_slice %196 {offsets = [0, 256], sizes = [8, 128], strides = [1, 1]} : vector<8x384xf32> to vector<8x128xf32>
    %215 = arith.mulf %204, %214 : vector<8x128xf32>
    %216 = arith.addf %213, %215 : vector<8x128xf32>
    %217 = math.tanh %216 : vector<8x128xf32>
    %cst_49 = arith.constant 1.000000e+00 : f32
    %218 = vector.broadcast %cst_49 : f32 to vector<8x128xf32>
    %219 = arith.subf %218, %212 : vector<8x128xf32>
    %220 = arith.mulf %219, %217 : vector<8x128xf32>
    %221 = arith.mulf %212, %187 : vector<8x128xf32>
    %222 = arith.addf %220, %221 : vector<8x128xf32>
    %c5 = arith.constant 5 : index
    %c0_50 = arith.constant 0 : index
    %c0_51 = arith.constant 0 : index
    %223 = vector.load %arg6[%c5, %c0_50, %c0_51] : memref<8x8x128xf32, #tpu.memory_space<vmem>>, vector<1x8x128xf32>
    %224 = vector.shape_cast %223 : vector<1x8x128xf32> to vector<8x128xf32>
    %225 = vector.shape_cast %222 : vector<8x128xf32> to vector<1x8x128xf32>
    tpu.vector_store %arg6[%c5, %c0_50, %c0_51], %225 {strides = array<i32>} : memref<8x8x128xf32, #tpu.memory_space<vmem>>, vector<1x8x128xf32>,
    %226 = vector.extract_strided_slice %14 {offsets = [6, 0, 0], sizes = [1, 8, 384], strides = [1, 1, 1]} : vector<8x8x384xf32> to vector<1x8x384xf32>
    %227 = vector.shape_cast %226 : vector<1x8x384xf32> to vector<8x384xf32>
    %228 = arith.truncf %222 : vector<8x128xf32> to vector<8x128xbf16>
    %cst_52 = arith.constant dense<0.000000e+00> : vector<8x384xf32>
    %229 = tpu.matmul %228, %4, %cst_52 {dimension_numbers = #tpu.dot_dimension_numbers<[1], [0], [0], [1], [0, 0, 1, 1], [], []>} : vector<8x128xbf16>, vector<128x384xbf16>, vector<8x384xf32> -> vector<8x384xf32>
    %230 = vector.broadcast %8 : vector<1x384xf32> to vector<8x384xf32>
    %231 = arith.addf %229, %230 : vector<8x384xf32>
    %232 = vector.extract_strided_slice %227 {offsets = [0, 0], sizes = [8, 128], strides = [1, 1]} : vector<8x384xf32> to vector<8x128xf32>
    %233 = vector.extract_strided_slice %231 {offsets = [0, 0], sizes = [8, 128], strides = [1, 1]} : vector<8x384xf32> to vector<8x128xf32>
    %234 = arith.addf %232, %233 : vector<8x128xf32>
    %235 = arith.negf %234 : vector<8x128xf32>
    %236 = math.exp %235 : vector<8x128xf32>
    %cst_53 = arith.constant 1.000000e+00 : f32
    %237 = vector.broadcast %cst_53 : f32 to vector<8x128xf32>
    %238 = arith.addf %237, %236 : vector<8x128xf32>
    %239 = arith.divf %237, %238 : vector<8x128xf32>
    %240 = vector.extract_strided_slice %227 {offsets = [0, 128], sizes = [8, 128], strides = [1, 1]} : vector<8x384xf32> to vector<8x128xf32>
    %241 = vector.extract_strided_slice %231 {offsets = [0, 128], sizes = [8, 128], strides = [1, 1]} : vector<8x384xf32> to vector<8x128xf32>
    %242 = arith.addf %240, %241 : vector<8x128xf32>
    %243 = arith.negf %242 : vector<8x128xf32>
    %244 = math.exp %243 : vector<8x128xf32>
    %cst_54 = arith.constant 1.000000e+00 : f32
    %245 = vector.broadcast %cst_54 : f32 to vector<8x128xf32>
    %246 = arith.addf %245, %244 : vector<8x128xf32>
    %247 = arith.divf %245, %246 : vector<8x128xf32>
    %248 = vector.extract_strided_slice %227 {offsets = [0, 256], sizes = [8, 128], strides = [1, 1]} : vector<8x384xf32> to vector<8x128xf32>
    %249 = vector.extract_strided_slice %231 {offsets = [0, 256], sizes = [8, 128], strides = [1, 1]} : vector<8x384xf32> to vector<8x128xf32>
    %250 = arith.mulf %239, %249 : vector<8x128xf32>
    %251 = arith.addf %248, %250 : vector<8x128xf32>
    %252 = math.tanh %251 : vector<8x128xf32>
    %cst_55 = arith.constant 1.000000e+00 : f32
    %253 = vector.broadcast %cst_55 : f32 to vector<8x128xf32>
    %254 = arith.subf %253, %247 : vector<8x128xf32>
    %255 = arith.mulf %254, %252 : vector<8x128xf32>
    %256 = arith.mulf %247, %222 : vector<8x128xf32>
    %257 = arith.addf %255, %256 : vector<8x128xf32>
    %c6 = arith.constant 6 : index
    %c0_56 = arith.constant 0 : index
    %c0_57 = arith.constant 0 : index
    %258 = vector.load %arg6[%c6, %c0_56, %c0_57] : memref<8x8x128xf32, #tpu.memory_space<vmem>>, vector<1x8x128xf32>
    %259 = vector.shape_cast %258 : vector<1x8x128xf32> to vector<8x128xf32>
    %260 = vector.shape_cast %257 : vector<8x128xf32> to vector<1x8x128xf32>
    tpu.vector_store %arg6[%c6, %c0_56, %c0_57], %260 {strides = array<i32>} : memref<8x8x128xf32, #tpu.memory_space<vmem>>, vector<1x8x128xf32>,
    %261 = vector.extract_strided_slice %14 {offsets = [7, 0, 0], sizes = [1, 8, 384], strides = [1, 1, 1]} : vector<8x8x384xf32> to vector<1x8x384xf32>
    %262 = vector.shape_cast %261 : vector<1x8x384xf32> to vector<8x384xf32>
    %263 = arith.truncf %257 : vector<8x128xf32> to vector<8x128xbf16>
    %cst_58 = arith.constant dense<0.000000e+00> : vector<8x384xf32>
    %264 = tpu.matmul %263, %4, %cst_58 {dimension_numbers = #tpu.dot_dimension_numbers<[1], [0], [0], [1], [0, 0, 1, 1], [], []>} : vector<8x128xbf16>, vector<128x384xbf16>, vector<8x384xf32> -> vector<8x384xf32>
    %265 = vector.broadcast %8 : vector<1x384xf32> to vector<8x384xf32>
    %266 = arith.addf %264, %265 : vector<8x384xf32>
    %267 = vector.extract_strided_slice %262 {offsets = [0, 0], sizes = [8, 128], strides = [1, 1]} : vector<8x384xf32> to vector<8x128xf32>
    %268 = vector.extract_strided_slice %266 {offsets = [0, 0], sizes = [8, 128], strides = [1, 1]} : vector<8x384xf32> to vector<8x128xf32>
    %269 = arith.addf %267, %268 : vector<8x128xf32>
    %270 = arith.negf %269 : vector<8x128xf32>
    %271 = math.exp %270 : vector<8x128xf32>
    %cst_59 = arith.constant 1.000000e+00 : f32
    %272 = vector.broadcast %cst_59 : f32 to vector<8x128xf32>
    %273 = arith.addf %272, %271 : vector<8x128xf32>
    %274 = arith.divf %272, %273 : vector<8x128xf32>
    %275 = vector.extract_strided_slice %262 {offsets = [0, 128], sizes = [8, 128], strides = [1, 1]} : vector<8x384xf32> to vector<8x128xf32>
    %276 = vector.extract_strided_slice %266 {offsets = [0, 128], sizes = [8, 128], strides = [1, 1]} : vector<8x384xf32> to vector<8x128xf32>
    %277 = arith.addf %275, %276 : vector<8x128xf32>
    %278 = arith.negf %277 : vector<8x128xf32>
    %279 = math.exp %278 : vector<8x128xf32>
    %cst_60 = arith.constant 1.000000e+00 : f32
    %280 = vector.broadcast %cst_60 : f32 to vector<8x128xf32>
    %281 = arith.addf %280, %279 : vector<8x128xf32>
    %282 = arith.divf %280, %281 : vector<8x128xf32>
    %283 = vector.extract_strided_slice %262 {offsets = [0, 256], sizes = [8, 128], strides = [1, 1]} : vector<8x384xf32> to vector<8x128xf32>
    %284 = vector.extract_strided_slice %266 {offsets = [0, 256], sizes = [8, 128], strides = [1, 1]} : vector<8x384xf32> to vector<8x128xf32>
    %285 = arith.mulf %274, %284 : vector<8x128xf32>
    %286 = arith.addf %283, %285 : vector<8x128xf32>
    %287 = math.tanh %286 : vector<8x128xf32>
    %cst_61 = arith.constant 1.000000e+00 : f32
    %288 = vector.broadcast %cst_61 : f32 to vector<8x128xf32>
    %289 = arith.subf %288, %282 : vector<8x128xf32>
    %290 = arith.mulf %289, %287 : vector<8x128xf32>
    %291 = arith.mulf %282, %257 : vector<8x128xf32>
    %292 = arith.addf %290, %291 : vector<8x128xf32>
    %c7 = arith.constant 7 : index
    %c0_62 = arith.constant 0 : index
    %c0_63 = arith.constant 0 : index
    %293 = vector.load %arg6[%c7, %c0_62, %c0_63] : memref<8x8x128xf32, #tpu.memory_space<vmem>>, vector<1x8x128xf32>
    %294 = vector.shape_cast %293 : vector<1x8x128xf32> to vector<8x128xf32>
    %295 = vector.shape_cast %292 : vector<8x128xf32> to vector<1x8x128xf32>
    tpu.vector_store %arg6[%c7, %c0_62, %c0_63], %295 {strides = array<i32>} : memref<8x8x128xf32, #tpu.memory_space<vmem>>, vector<1x8x128xf32>,
    %c0_64 = arith.constant 0 : index
    %c0_65 = arith.constant 0 : index
    %296 = vector.load %arg8[%c0_64, %c0_65] : memref<8x128xf32, #tpu.memory_space<vmem>>, vector<8x128xf32>
    tpu.vector_store %arg8[%c0_64, %c0_65], %292 {strides = array<i32>} : memref<8x128xf32, #tpu.memory_space<vmem>>, vector<8x128xf32>,
    %c0_i32_66 = arith.constant 0 : i32
    %297 = arith.cmpi eq, %arg0, %c0_i32_66 : i32
    %298 = arith.extui %297 : i1 to i32
    %c0_i32_67 = arith.constant 0 : i32
    %299 = arith.cmpi ne, %298, %c0_i32_67 : i32
    scf.if %299 {
      %c0_68 = arith.constant 0 : index
      %c0_69 = arith.constant 0 : index
      %300 = vector.load %arg7[%c0_68, %c0_69] : memref<8x128xf32, #tpu.memory_space<vmem>>, vector<8x128xf32>
      tpu.vector_store %arg7[%c0_68, %c0_69], %292 {strides = array<i32>} : memref<8x128xf32, #tpu.memory_space<vmem>>, vector<8x128xf32>,
    } else {
    }
    return
  }
  func.func @transform_0(%arg0: i32) -> (i32, i32, i32) {
    %c0_i32 = arith.constant 0 : i32
    %c0_i32_0 = arith.constant 0 : i32
    %c0_i32_1 = arith.constant 0 : i32
    return %arg0, %c0_i32, %c0_i32_0 : i32, i32, i32
  }
  func.func @transform_1(%arg0: i32) -> (i32, i32) {
    %c0_i32 = arith.constant 0 : i32
    %c0_i32_0 = arith.constant 0 : i32
    %c0_i32_1 = arith.constant 0 : i32
    return %c0_i32, %c0_i32_0 : i32, i32
  }
  func.func @transform_2(%arg0: i32) -> (i32, i32) {
    %c0_i32 = arith.constant 0 : i32
    %c0_i32_0 = arith.constant 0 : i32
    %c0_i32_1 = arith.constant 0 : i32
    return %c0_i32, %c0_i32_0 : i32, i32
  }
  func.func @transform_3(%arg0: i32) -> (i32, i32) {
    %c0_i32 = arith.constant 0 : i32
    %c0_i32_0 = arith.constant 0 : i32
    %c0_i32_1 = arith.constant 0 : i32
    return %c0_i32, %c0_i32_0 : i32, i32
  }
  func.func @transform_4(%arg0: i32) -> (i32, i32, i32) {
    %c0_i32 = arith.constant 0 : i32
    %c0_i32_0 = arith.constant 0 : i32
    %c0_i32_1 = arith.constant 0 : i32
    %c0_i32_2 = arith.constant 0 : i32
    return %c0_i32, %c0_i32_0, %c0_i32_1 : i32, i32, i32
  }
  func.func @transform_5(%arg0: i32) -> (i32, i32, i32) {
    %c0_i32 = arith.constant 0 : i32
    %c0_i32_0 = arith.constant 0 : i32
    %c0_i32_1 = arith.constant 0 : i32
    return %arg0, %c0_i32, %c0_i32_0 : i32, i32, i32
  }
  func.func @transform_6(%arg0: i32) -> (i32, i32) {
    %c0_i32 = arith.constant 0 : i32
    %c0_i32_0 = arith.constant 0 : i32
    %c0_i32_1 = arith.constant 0 : i32
    return %c0_i32, %c0_i32_0 : i32, i32
  }
}

</mosaic_0001>

<bundles_post_ra>
// kernel: gru_forward_impl.1
= control target key start
LH: loop header
LB: loop body
LE: loop exit
PB: predicated region body
PF: predicated region fallthrough
CT: control target
= control target key end

     0   :  { %12 = vsyncpa [#allocation4], 0  ;;  %s2151_s0 = inlined_call_operand.vmem [shape: bf16[8,8,128], index: 0, kind: input, shape index: {}]   ;;  %s2152_s1 = inlined_call_operand.vmem [shape: f32[8,128], index: 1, kind: input, shape index: {}]   ;;  %s2153_s2 = inlined_call_operand.hbm [shape: bf16[128,384], index: 2, kind: input, shape index: {}]   ;;  %s2154_s3 = inlined_call_operand.hbm [shape: bf16[128,384], index: 3, kind: input, shape index: {}]   ;;  %s2155_s4 = inlined_call_operand.vmem [shape: f32[2,1,384], index: 4, kind: input, shape index: {}]   ;;  %s2156_s5 = inlined_call_operand.vmem [shape: f32[8,8,128], index: 5, kind: output, shape index: {0}]   ;;  %s2157_s6 = inlined_call_operand.vmem [shape: f32[8,128], index: 6, kind: output, shape index: {1}]  }
   0x1   :  { %s22_s23 = sshll.u32 %s2153_s2, 4  ;;  %s23_s23 = int_to_ptr.hbm [resolvable:$true] %s22_s23 }
   0x2   :  { %13 = vsyncpa [#allocation6], 0  ;;  %s1663_s24 = smov [#allocation3]   ;;  %s35_s28 = sshll.u32 %s2154_s3, 4  ;;  %s36_s28 = int_to_ptr.hbm [resolvable:$true] %s35_s28 }
   0x3   :  { %s24_s25 = sshll.u32 %s1663_s24, 4  ;;  %s1664_s29 = smov 192   ;;  %s25_s25 = int_to_ptr.vmem [resolvable:$true] %s24_s25 }
   0x4   :  { %s1665_s30 = smov 12   ;;  %s1666_s7 = smov [#allocation5]  }
   0x5   :  { %30 = dma.hbm_to_vmem [thread:$0]  %s23_s23, 3072, %s25_s25, [#allocation4], %s1664_s29, %s1664_s29, %s1665_s30  }
   0x6   :  { %s37_s8 = sshll.u32 %s1666_s7, 4  ;;  %s38_s8 = int_to_ptr.vmem [resolvable:$true] %s37_s8 }
   0x7   :  { %43 = dma.hbm_to_vmem [thread:$0]  %s36_s28, 3072, %s38_s8, [#allocation6], %s1664_s29, %s1664_s29, %s1665_s30  }
   0x8   :  { %1659 = dma.done.wait [#allocation4], 3072  }
   0x9   :  { %1660 = vsyncadd [#allocation4], 4294964224 }
   0xa   :  { %1661 = dma.done.wait [#allocation6], 3072  }
   0xb   :  { %1662 = vsyncadd [#allocation6], 4294964224  ;;  %v1346_v0 = vld [vmem:[#allocation3 + $0xa8] sm:$0xf]  ;;  %v1497_v1 = vld [vmem:[#allocation3 + $0xb0] sm:$0xf0] }
   0xc   :  { %v1442_v2 = vld [vmem:[#allocation5 + $0xa8] sm:$0xf]  ;;  %v1347_v3 = vor.u32 %v1497_v1, %v1346_v0  ;;  %v1521_v4 = vld [vmem:[#allocation5 + $0xb0] sm:$0xf0]  ;;  %v1334_v5 = vld [vmem:[#allocation3 + $0x90] sm:$0xf] }
   0xd   :  { %v1494_v6 = vld [vmem:[#allocation3 + $0x98] sm:$0xf0]  ;;  %v1708_v7 = vor.u32 %v1521_v4, %v1442_v2  ;;  %v1430_v8 = vld [vmem:[#allocation5 + $0x90] sm:$0xf]  ;;  %v1322_v12 = vld [vmem:[#allocation3 + $0x78] sm:$0xf] }
   0xe   :  { %v1518_v9 = vld [vmem:[#allocation5 + $0x98] sm:$0xf0]  ;;  %294 = vmatpush.bf16.msra.mxu0 %v1347_v3  ;;  %v1335_v10 = vor.u32 %v1494_v6, %v1334_v5  ;;  %v1491_v13 = vld [vmem:[#allocation3 + $0x80] sm:$0xf0]  ;;  %v1418_v14 = vld [vmem:[#allocation5 + $0x78] sm:$0xf] }
   0xf   :  { %518 = vmatpush.bf16.msra.mxu3 %v1708_v7  ;;  %v1711_v11 = vor.u32 %v1518_v9, %v1430_v8  ;;  %v1515_v15 = vld [vmem:[#allocation5 + $0x80] sm:$0xf0]  ;;  %v1323_v16 = vor.u32 %v1491_v13, %v1322_v12  ;;  %v1310_v18 = vld [vmem:[#allocation3 + $0x60] sm:$0xf]  ;;  %v1488_v19 = vld [vmem:[#allocation3 + $0x68] sm:$0xf0] }
  0x10   :  { %v1714_v17 = vor.u32 %v1515_v15, %v1418_v14  ;;  %v1406_v20 = vld [vmem:[#allocation5 + $0x60] sm:$0xf]  ;;  %v1512_v21 = vld [vmem:[#allocation5 + $0x68] sm:$0xf0]  ;;  %v1311_v22 = vor.u32 %v1488_v19, %v1310_v18  ;;  %v1298_v24 = vld [vmem:[#allocation3 + $0x48] sm:$0xf] }
  0x11   :  { %v1717_v23 = vor.u32 %v1512_v21, %v1406_v20  ;;  %v1485_v25 = vld [vmem:[#allocation3 + $0x50] sm:$0xf0]  ;;  %v1394_v26 = vld [vmem:[#allocation5 + $0x48] sm:$0xf]  ;;  %v1496_v28 = vld [vmem:[#allocation3 + $0xac] sm:$0xf] }
  0x12   :  { %295 = vmatpush.bf16.msra.mxu0 %v1335_v10  ;;  %v1509_v27 = vld [vmem:[#allocation5 + $0x50] sm:$0xf0]  ;;  %v1348_v29 = vld [vmem:[#allocation3 + $0xb4] sm:$0xf0]  ;;  %v1299_v32 = vor.u32 %v1485_v25, %v1298_v24  ;;  %v1336_v33 = vld [vmem:[#allocation3 + $0x9c] sm:$0xf0] }
  0x13   :  { %519 = vmatpush.bf16.msra.mxu3 %v1711_v11  ;;  %v1351_v30 = vor.u32 %v1496_v28, %v1348_v29  ;;  %v1493_v31 = vld [vmem:[#allocation3 + $0x94] sm:$0xf]  ;;  %v1720_v34 = vor.u32 %v1509_v27, %v1394_v26  ;;  %v1286_v35 = vld [vmem:[#allocation3 + $0x30] sm:$0xf]  ;;  %v1482_v36 = vld [vmem:[#allocation3 + $0x38] sm:$0xf0] }
  0x14   :  { %v1382_v37 = vld [vmem:[#allocation5 + $0x30] sm:$0xf]  ;;  %v1339_v38 = vor.u32 %v1493_v31, %v1336_v33  ;;  %v1506_v39 = vld [vmem:[#allocation5 + $0x38] sm:$0xf0]  ;;  %v1324_v41 = vld [vmem:[#allocation3 + $0x84] sm:$0xf0]  ;;  %v1287_v42 = vor.u32 %v1482_v36, %v1286_v35 }
  0x15   :  { %323 = vmatpush.bf16.msra.mxu1 %v1351_v30  ;;  %v1490_v40 = vld [vmem:[#allocation3 + $0x7c] sm:$0xf]  ;;  %v1274_v43 = vld [vmem:[#allocation3 + $0x18] sm:$0xf]  ;;  %v1479_v44 = vld [vmem:[#allocation3 + $0x20] sm:$0xf0]  ;;  %v1723_v45 = vor.u32 %v1506_v39, %v1382_v37 }
  0x16   :  { %296 = vmatpush.bf16.msra.mxu0 %v1323_v16  ;;  %v1370_v46 = vld [vmem:[#allocation5 + $0x18] sm:$0xf]  ;;  %v1503_v47 = vld [vmem:[#allocation5 + $0x20] sm:$0xf0]  ;;  %v1327_v48 = vor.u32 %v1490_v40, %v1324_v41  ;;  %v1312_v50 = vld [vmem:[#allocation3 + $0x6c] sm:$0xf0]  ;;  %v1275_v54 = vor.u32 %v1479_v44, %v1274_v43 }
  0x17   :  { %520 = vmatpush.bf16.msra.mxu3 %v1714_v17  ;;  %v1487_v49 = vld [vmem:[#allocation3 + $0x64] sm:$0xf]  ;;  %v1354_v51 = vld [vmem:[#allocation3 + $0xb0] sm:$0xf]  ;;  %v1498_v52 = vld [vmem:[#allocation3 + $0xb8] sm:$0xf0]  ;;  %v1726_v58 = vor.u32 %v1503_v47, %v1370_v46 }
  0x18   :  { %v1355_v53 = vor.u32 %v1498_v52, %v1354_v51  ;;  %v1262_v55 = vld [vmem:[#allocation3] sm:$0xf]  ;;  %v1476_v56 = vld [vmem:[#allocation3 + $0x8] sm:$0xf0]  ;;  %v1444_v61 = vld [vmem:[#allocation5 + $0xb4] sm:$0xf0]  ;;  %v1315_v62 = vor.u32 %v1487_v49, %v1312_v50 }
  0x19   :  { %324 = vmatpush.bf16.msra.mxu1 %v1339_v38  ;;  %v1358_v57 = vld [vmem:[#allocation5] sm:$0xf]  ;;  %v1500_v59 = vld [vmem:[#allocation5 + $0x8] sm:$0xf0]  ;;  %v1450_v63 = vld [vmem:[#allocation5 + $0xb0] sm:$0xf]  ;;  %v1263_v5 = vor.u32 %v1476_v56, %v1262_v55 }
  0x1a   :  { %297 = vmatpush.bf16.msra.mxu0 %v1311_v22  ;;  %v1520_v60 = vld [vmem:[#allocation5 + $0xac] sm:$0xf]  ;;  %v1522_v0 = vld [vmem:[#allocation5 + $0xb8] sm:$0xf0]  ;;  %352 = vmatpush.bf16.msra.mxu2 %v1355_v53  ;;  %v1342_v1 = vld [vmem:[#allocation3 + $0x98] sm:$0xf]  ;;  %v1729_v8 = vor.u32 %v1500_v59, %v1358_v57 }
  0x1b   :  { %521 = vmatpush.bf16.msra.mxu3 %v1717_v23  ;;  %v1484_v2 = vld [vmem:[#allocation3 + $0x4c] sm:$0xf]  ;;  %v1300_v3 = vld [vmem:[#allocation3 + $0x54] sm:$0xf0]  ;;  %v1495_v4 = vld [vmem:[#allocation3 + $0xa0] sm:$0xf0]  ;;  %v1741_v12 = vor.u32 %v1522_v0, %v1450_v63  ;;  %v1743_v15 = vor.u32 %v1520_v60, %v1444_v61 }
  0x1c   :  { %v1343_v6 = vor.u32 %v1495_v4, %v1342_v1  ;;  %v1734_v9 = vld [vmem:[%s2151_s0] sm:$0xff]  ;;  %v1517_v13 = vld [vmem:[#allocation5 + $0x94] sm:$0xf]  ;;  %v1438_v14 = vld [vmem:[#allocation5 + $0x98] sm:$0xf]  ;;  %v1303_v18 = vor.u32 %v1484_v2, %v1300_v3 }
  0x1d   :  { %325 = vmatpush.bf16.msra.mxu1 %v1327_v48  ;;  %v1739_v10 = vld [vmem:[%s2152_s1] sm:$0xff]  ;;  %v1492_v20 = vld [vmem:[#allocation3 + $0x88] sm:$0xf0]  ;;  %v1481_v22 = vld [vmem:[#allocation3 + $0x34] sm:$0xf] }
  0x1e   :  { %298 = vmatpush.bf16.msra.mxu0 %v1299_v32  ;;  %v1519_v16 = vld [vmem:[#allocation5 + $0xa0] sm:$0xf0]  ;;  %353 = vmatpush.bf16.msra.mxu2 %v1343_v6  ;;  %v1330_v19 = vld [vmem:[#allocation3 + $0x80] sm:$0xf]  ;;  %v1747_v26 = vpack.c.bf16 %v1739_v10, %v1739_v10  ;;  %v1514_v27 = vld [vmem:[#allocation5 + $0x7c] sm:$0xf] }
  0x1f   :  { %522 = vmatpush.bf16.msra.mxu3 %v1720_v34  ;;  %v1432_v21 = vld [vmem:[#allocation5 + $0x9c] sm:$0xf0]  ;;  %v1331_v25 = vor.u32 %v1492_v20, %v1330_v19  ;;  %v1751_v28 = vor.u32 %v1519_v16, %v1438_v14  ;;  %v1516_v31 = vld [vmem:[#allocation5 + $0x88] sm:$0xf0]  ;;  %v1318_v33 = vld [vmem:[#allocation3 + $0x68] sm:$0xf] }
  0x20   :  { %v1288_v24 = vld [vmem:[#allocation3 + $0x3c] sm:$0xf0]  ;;  %v1754_v30 = vor.u32 %v1517_v13, %v1432_v21  ;;  %v1489_v35 = vld [vmem:[#allocation3 + $0x70] sm:$0xf0]  ;;  %v1420_v36 = vld [vmem:[#allocation5 + $0x84] sm:$0xf0] }
  0x21   :  { %326 = vmatpush.bf16.msra.mxu1 %v1315_v62  ;;  %v1426_v29 = vld [vmem:[#allocation5 + $0x80] sm:$0xf]  ;;  %v1291_v32 = vor.u32 %v1481_v22, %v1288_v24  ;;  %v1478_v37 = vld [vmem:[#allocation3 + $0x1c] sm:$0xf]  ;;  %v1276_v38 = vld [vmem:[#allocation3 + $0x24] sm:$0xf0]  ;;  %v1319_v39 = vor.u32 %v1489_v35, %v1318_v33  ;;  %v1762_v43 = vor.u32 %v1514_v27, %v1420_v36 }
  0x22   :  { %299 = vmatpush.bf16.msra.mxu0 %v1287_v42  ;;  %354 = vmatpush.bf16.msra.mxu2 %v1331_v25  ;;  %v1306_v40 = vld [vmem:[#allocation3 + $0x50] sm:$0xf]  ;;  %v1486_v41 = vld [vmem:[#allocation3 + $0x58] sm:$0xf0]  ;;  %v1759_v42 = vor.u32 %v1516_v31, %v1426_v29  ;;  %v1511_v44 = vld [vmem:[#allocation5 + $0x64] sm:$0xf]  ;;  %v1279_v48 = vor.u32 %v1478_v37, %v1276_v38 }
  0x23   :  { %523 = vmatpush.bf16.msra.mxu3 %v1723_v45  ;;  %v1414_v46 = vld [vmem:[#allocation5 + $0x68] sm:$0xf]  ;;  %v1513_v47 = vld [vmem:[#allocation5 + $0x70] sm:$0xf0]  ;;  %v1408_v49 = vld [vmem:[#allocation5 + $0x6c] sm:$0xf0]  ;;  %v1307_v52 = vor.u32 %v1486_v41, %v1306_v40 }
  0x24   :  { %v1475_v50 = vld [vmem:[#allocation3 + $0x4] sm:$0xf]  ;;  %v1264_v51 = vld [vmem:[#allocation3 + $0xc] sm:$0xf0]  ;;  %v1294_v53 = vld [vmem:[#allocation3 + $0x38] sm:$0xf]  ;;  %v1765_v55 = vor.u32 %v1513_v47, %v1414_v46  ;;  %v1768_v56 = vor.u32 %v1511_v44, %v1408_v49 }
  0x25   :  { %327 = vmatpush.bf16.msra.mxu1 %v1303_v18  ;;  %v1267_v57 = vor.u32 %v1475_v50, %v1264_v51  ;;  %v1402_v59 = vld [vmem:[#allocation5 + $0x50] sm:$0xf]  ;;  %v1510_v60 = vld [vmem:[#allocation5 + $0x58] sm:$0xf0]  ;;  %v1508_v61 = vld [vmem:[#allocation5 + $0x4c] sm:$0xf] }
  0x26   :  { %300 = vmatpush.bf16.msra.mxu0 %v1275_v54  ;;  %355 = vmatpush.bf16.msra.mxu2 %v1319_v39  ;;  %v1483_v54 = vld [vmem:[#allocation3 + $0x40] sm:$0xf0]  ;;  %v1396_v62 = vld [vmem:[#allocation5 + $0x54] sm:$0xf0]  ;;  %v1282_v0 = vld [vmem:[#allocation3 + $0x20] sm:$0xf]  ;;  %v1771_v2 = vor.u32 %v1510_v60, %v1402_v59 }
  0x27   :  { %524 = vmatpush.bf16.msra.mxu3 %v1726_v58  ;;  %v1295_v63 = vor.u32 %v1483_v54, %v1294_v53  ;;  %v1480_v1 = vld [vmem:[#allocation3 + $0x28] sm:$0xf0]  ;;  %v1774_v3 = vor.u32 %v1508_v61, %v1396_v62  ;;  %v1390_v4 = vld [vmem:[#allocation5 + $0x38] sm:$0xf]  ;;  %v1505_v13 = vld [vmem:[#allocation5 + $0x34] sm:$0xf] }
  0x28   :  { %v1524_v6 = vld [vmem:[%s2151_s0 + $0x8] sm:$0xff]  ;;  %v1384_v14 = vld [vmem:[#allocation5 + $0x3c] sm:$0xf0]  ;;  %v1283_v16 = vor.u32 %v1480_v1, %v1282_v0  ;;  %v1502_v20 = vld [vmem:[#allocation5 + $0x1c] sm:$0xf] }
  0x29   :  { %328 = vmatpush.bf16.msra.mxu1 %v1291_v32  ;;  %v1785_v19 = vor.u32 %v1505_v13, %v1384_v14  ;;  %v1270_v21 = vld [vmem:[#allocation3 + $0x8] sm:$0xf]  ;;  %v1477_v22 = vld [vmem:[#allocation3 + $0x10] sm:$0xf0]  ;;  %v1378_v25 = vld [vmem:[#allocation5 + $0x20] sm:$0xf] }
  0x2a   :  { %301 = vmatpush.bf16.msra.mxu0 %v1263_v5  ;;  %356 = vmatpush.bf16.msra.mxu2 %v1307_v52  ;;  %v1507_v5 = vld [vmem:[#allocation5 + $0x40] sm:$0xf0]  ;;  %v1372_v24 = vld [vmem:[#allocation5 + $0x24] sm:$0xf0]  ;;  %v1504_v27 = vld [vmem:[#allocation5 + $0x28] sm:$0xf0]  ;;  %v1271_v29 = vor.u32 %v1477_v22, %v1270_v21 }
  0x2b   :  { %525 = vmatpush.bf16.msra.mxu3 %v1729_v8  ;;  %v1782_v18 = vor.u32 %v1507_v5, %v1390_v4  ;;  %v1789_v31 = vor.u32 %v1504_v27, %v1378_v25  ;;  %v1792_v32 = vor.u32 %v1502_v20, %v1372_v24  ;;  %v1366_v33 = vld [vmem:[#allocation5 + $0x8] sm:$0xf]  ;;  %v1501_v35 = vld [vmem:[#allocation5 + $0x10] sm:$0xf0]  ;;  %v1499_v36 = vld [vmem:[#allocation5 + $0x4] sm:$0xf] }
  0x2c   :  { %v1360_v37 = vld [vmem:[#allocation5 + $0xc] sm:$0xf0]  ;;  %v1797_v38 = vor.u32 %v1501_v35, %v1366_v33  ;;  %v124_v41 = vld [vmem:[%s2155_s4] sm:$0x7]  ;;  %v1243_v44 = vld [vmem:[%s2155_s4 + $0x3] sm:$0x7] }
  0x2d   :  { %302 = vmatmul.bf16.vlgmr.msra.gmra.mxu0 %v1734_v9  ;;  %329 = vmatpush.bf16.msra.mxu1 %v1279_v48  ;;  %v1800_v39 = vor.u32 %v1499_v36, %v1360_v37  ;;  %v1525_v40 = vld [vmem:[%s2151_s0 + $0x10] sm:$0xff]  ;;  %v136_v46 = vperm.slane %v124_v41, 0  ;;  %v1879_v49 = vperm.slane %v1243_v44, 0  ;;  %v1888_v1 = vperm.slane %v124_v41, 1 }
  0x2e   :  { %544 = vmatpush.bf16.msrb.mxu0 %v1741_v12  ;;  %526 = vmatmul.bf16.vlgmr.msra.gmra.mxu3 %v1747_v26  ;;  %v1892_v13 = vperm.slane %v1243_v44, 1 }
  0x2f   :  { %531 = vmatpush.bf16.msrb.mxu3 %v1743_v15  ;;  %357 = vmatpush.bf16.msra.mxu2 %v1295_v63 }
  0x31   :  { %330 = vmatpush.bf16.msra.mxu1 %v1267_v57 }
  0x32   :  { %545 = vmatpush.bf16.msrb.mxu0 %v1751_v28 }
  0x33   :  { %532 = vmatpush.bf16.msrb.mxu3 %v1754_v30  ;;  %358 = vmatpush.bf16.msra.mxu2 %v1283_v16  ;;  %v1894_v16 = vperm.slane %v124_v41, 2 }
  0x34   :  { %331 = vmatmul.bf16.vlgmr.msra.gmra.mxu1 %v1734_v9 }
  0x35   :  { %606 = vmatpush.bf16.msrb.mxu1 %v1708_v7  ;;  %2159 = vst [vmem:[#allocation9_spill] sm:$0xff] %v1894_v16 }
  0x36   :  { %546 = vmatpush.bf16.msrb.mxu0 %v1759_v42 }
  0x37   :  { %533 = vmatpush.bf16.msrb.mxu3 %v1762_v43  ;;  %359 = vmatpush.bf16.msra.mxu2 %v1271_v29 }
  0x39   :  { %607 = vmatpush.bf16.msrb.mxu1 %v1711_v11 }
  0x3a   :  { %547 = vmatpush.bf16.msrb.mxu0 %v1765_v55  ;;  %360 = vmatmul.bf16.vlgmr.msra.gmra.mxu2 %v1734_v9  ;;  %v1526_v9 = vld [vmem:[%s2151_s0 + $0x18] sm:$0xff] }
  0x3b   :  { %534 = vmatpush.bf16.msrb.mxu3 %v1768_v56  ;;  %619 = vmatpush.bf16.msrb.mxu2 %v1743_v15 }
  0x3d   :  { %307 = vmatmul.bf16.gmra.mxu0 %v1524_v6  ;;  %608 = vmatpush.bf16.msrb.mxu1 %v1714_v17 }
  0x3e   :  { %548 = vmatpush.bf16.msrb.mxu0 %v1771_v2 }
  0x3f   :  { %535 = vmatpush.bf16.msrb.mxu3 %v1774_v3  ;;  %620 = vmatpush.bf16.msrb.mxu2 %v1754_v30 }
  0x41   :  { %609 = vmatpush.bf16.msrb.mxu1 %v1717_v23 }
  0x42   :  { %549 = vmatpush.bf16.msrb.mxu0 %v1782_v18 }
  0x43   :  { %536 = vmatpush.bf16.msrb.mxu3 %v1785_v19  ;;  %621 = vmatpush.bf16.msrb.mxu2 %v1762_v43 }
  0x44   :  { %336 = vmatmul.bf16.gmra.mxu1 %v1524_v6 }
  0x45   :  { %610 = vmatpush.bf16.msrb.mxu1 %v1720_v34 }
  0x46   :  { %550 = vmatpush.bf16.msrb.mxu0 %v1789_v31 }
  0x47   :  { %537 = vmatpush.bf16.msrb.mxu3 %v1792_v32  ;;  %622 = vmatpush.bf16.msrb.mxu2 %v1768_v56 }
  0x49   :  { %611 = vmatpush.bf16.msrb.mxu1 %v1723_v45 }
  0x4a   :  { %551 = vmatpush.bf16.msrb.mxu0 %v1797_v38  ;;  %365 = vmatmul.bf16.gmra.mxu2 %v1524_v6 }
  0x4b   :  { %538 = vmatpush.bf16.msrb.mxu3 %v1800_v39  ;;  %623 = vmatpush.bf16.msrb.mxu2 %v1774_v3 }
  0x4d   :  { %312 = vmatmul.bf16.gmra.mxu0 %v1525_v40  ;;  %612 = vmatpush.bf16.msrb.mxu1 %v1726_v58 }
  0x4e   :  { %695 = vmatpush.bf16.msra.mxu0 %v1708_v7  ;;  %539 = vmatmul.bf16.vlgmr.msrb.gmra.mxu3 %v1747_v26 }
  0x4f   :  { %632 = vmatpush.bf16.msra.mxu3 %v1741_v12  ;;  %624 = vmatpush.bf16.msrb.mxu2 %v1785_v19 }
  0x51   :  { %613 = vmatpush.bf16.msrb.mxu1 %v1729_v8 }
  0x52   :  { %696 = vmatpush.bf16.msra.mxu0 %v1711_v11 }
  0x53   :  { %633 = vmatpush.bf16.msra.mxu3 %v1751_v28  ;;  %625 = vmatpush.bf16.msrb.mxu2 %v1792_v32 }
  0x54   :  { %341 = vmatmul.bf16.gmra.mxu1 %v1525_v40 }
  0x55   :  { %708 = vmatpush.bf16.msra.mxu1 %v1743_v15 }
  0x56   :  { %697 = vmatpush.bf16.msra.mxu0 %v1714_v17 }
  0x57   :  { %634 = vmatpush.bf16.msra.mxu3 %v1759_v42  ;;  %626 = vmatpush.bf16.msrb.mxu2 %v1800_v39 }
  0x59   :  { %709 = vmatpush.bf16.msra.mxu1 %v1754_v30 }
  0x5a   :  { %698 = vmatpush.bf16.msra.mxu0 %v1717_v23  ;;  %370 = vmatmul.bf16.gmra.mxu2 %v1525_v40 }
  0x5b   :  { %635 = vmatpush.bf16.msra.mxu3 %v1765_v55  ;;  %721 = vmatpush.bf16.msra.mxu2 %v1741_v12 }
  0x5d   :  { %317 = vmatmul.bf16.gmra.mxu0 %v1526_v9  ;;  %710 = vmatpush.bf16.msra.mxu1 %v1762_v43 }
  0x5e   :  { %699 = vmatpush.bf16.msra.mxu0 %v1720_v34 }
  0x5f   :  { %636 = vmatpush.bf16.msra.mxu3 %v1771_v2  ;;  %722 = vmatpush.bf16.msra.mxu2 %v1751_v28 }
  0x61   :  { %711 = vmatpush.bf16.msra.mxu1 %v1768_v56 }
  0x62   :  { %700 = vmatpush.bf16.msra.mxu0 %v1723_v45 }
  0x63   :  { %637 = vmatpush.bf16.msra.mxu3 %v1782_v18  ;;  %723 = vmatpush.bf16.msra.mxu2 %v1759_v42 }
  0x64   :  { %346 = vmatmul.bf16.gmra.mxu1 %v1526_v9 }
  0x65   :  { %712 = vmatpush.bf16.msra.mxu1 %v1774_v3 }
  0x66   :  { %701 = vmatpush.bf16.msra.mxu0 %v1726_v58 }
  0x67   :  { %638 = vmatpush.bf16.msra.mxu3 %v1789_v31  ;;  %724 = vmatpush.bf16.msra.mxu2 %v1765_v55 }
  0x69   :  { %713 = vmatpush.bf16.msra.mxu1 %v1785_v19 }
  0x6a   :  { %702 = vmatpush.bf16.msra.mxu0 %v1729_v8  ;;  %375 = vmatmul.bf16.gmra.mxu2 %v1526_v9 }
  0x6b   :  { %639 = vmatpush.bf16.msra.mxu3 %v1797_v38  ;;  %725 = vmatpush.bf16.msra.mxu2 %v1771_v2 }
  0x6d   :  { %552 = vmatmul.bf16.vlgmr.msrb.gmra.mxu0 %v1747_v26  ;;  %714 = vmatpush.bf16.msra.mxu1 %v1792_v32 }
  0x6e   :  { %797 = vmatpush.bf16.msrb.mxu0 %v1743_v15 }
  0x6f   :  { %784 = vmatpush.bf16.msrb.mxu3 %v1708_v7  ;;  %726 = vmatpush.bf16.msra.mxu2 %v1782_v18 }
  0x71   :  { %715 = vmatpush.bf16.msra.mxu1 %v1800_v39 }
  0x72   :  { %798 = vmatpush.bf16.msrb.mxu0 %v1754_v30 }
  0x73   :  { %785 = vmatpush.bf16.msrb.mxu3 %v1711_v11  ;;  %727 = vmatpush.bf16.msra.mxu2 %v1789_v31 }
  0x76   :  { %799 = vmatpush.bf16.msrb.mxu0 %v1762_v43 }
  0x77   :  { %786 = vmatpush.bf16.msrb.mxu3 %v1714_v17  ;;  %728 = vmatpush.bf16.msra.mxu2 %v1797_v38 }
  0x7a   :  { %800 = vmatpush.bf16.msrb.mxu0 %v1768_v56 }
  0x7b   :  { %787 = vmatpush.bf16.msrb.mxu3 %v1717_v23 }
  0x7e   :  { %801 = vmatpush.bf16.msrb.mxu0 %v1774_v3 }
  0x7f   :  { %788 = vmatpush.bf16.msrb.mxu3 %v1720_v34 }
  0x82   :  { %802 = vmatpush.bf16.msrb.mxu0 %v1785_v19 }
  0x83   :  { %789 = vmatpush.bf16.msrb.mxu3 %v1723_v45 }
  0x86   :  { %803 = vmatpush.bf16.msrb.mxu0 %v1792_v32 }
  0x87   :  { %790 = vmatpush.bf16.msrb.mxu3 %v1726_v58 }
  0x8a   :  { %804 = vmatpush.bf16.msrb.mxu0 %v1800_v39 }
  0x8b   :  { %791 = vmatpush.bf16.msrb.mxu3 %v1729_v8 }
  0xaa   :  { %v303_v26 = vpop.f32.mrf.mxu0 }
  0xab   :  { %v304_v52 = vadd.f32 %v303_v26, %v136_v46 }
  0xb1   :  { %v527_v47 = vpop.f32.mrf.mxu3  ;;  %v332_v5 = vpop.f32.mrf.mxu1 }
  0xb2   :  { %v305_v48 = vpop.f32.mrf.mxu0  ;;  %v528_v51 = vadd.f32 %v527_v47, %v1879_v49  ;;  %v333_v20 = vadd.f32 %v332_v5, %v1888_v1 }
  0xb3   :  { %v1881_v50 = vadd.f32 %v305_v48, %v136_v46 }
  0xb4   :  { %v557_v57 = vadd.f32 %v528_v51, %v304_v52 }
  0xb6   :  { %v1452_v60 = vmul.f32 -1.442695, %v557_v57 }
  0xb8   :  { %1531 = vpow2.f32 %v1452_v60 }
  0xb9   :  { %v529_v53 = vpop.f32.mrf.mxu3 }
  0xba   :  { %v308_v54 = vpop.f32.mrf.mxu0 }
  0xbb   :  { %v1884_v59 = vadd.f32 %v308_v54, %v136_v46 }
  0xbd   :  { %v361_v63 = vpop.f32.mrf.mxu2 }
  0xbe   :  { %v1532_v0 = vpop.eup %1531 }
  0xbf   :  { %v561_v14 = vadd.f32 1.0, %v1532_v0 }
  0xc1   :  { %1533 = vrcp.f32 %v561_v14  ;;  %vm567_vm1 = vweird.f32 %v561_v14 }
  0xc2   :  { %v310_v61 = vpop.f32.mrf.mxu0 }
  0xc3   :  { %v1886_v62 = vadd.f32 %v310_v61, %v136_v46 }
  0xc5   :  { %v363_v24 = vpop.f32.mrf.mxu2 }
  0xc6   :  { %v1899_v25 = vadd.f32 %v363_v24, %v1894_v16 }
  0xc7   :  { %v1534_v36 = vpop.eup %1533 }
  0xc8   :  { %v563_v40 = vmul.f32 %v1534_v36, %v561_v14  ;;  %vm568_vm0 = vweird.f32 %v1534_v36 }
  0xc9   :  { %vm569_vm2 = vmor %vm567_vm1, %vm568_vm0 }
  0xca   :  { %v313_v4 = vpop.f32.mrf.mxu0  ;;  %v564_v48 = vsub.f32 1.0, %v563_v40 }
  0xcb   :  { %v1890_v6 = vadd.f32 %v313_v4, %v136_v46  ;;  %v573_v4 = vand.u32 2147483648, %v561_v14 }
  0xcc   :  { %v565_v53 = vmul.f32 %v1534_v36, %v564_v48 }
  0xcd   :  { %v366_v51 = vpop.f32.mrf.mxu2 }
  0xce   :  { %v1906_v52 = vadd.f32 %v366_v51, %v1894_v16  ;;  %v566_v0 = vadd.f32 %v1534_v36, %v565_v53 }
  0xd1   :  { %v540_v21 = vpop.f32.mrf.mxu3 }
  0xd2   :  { %v541_v22 = vadd.f32 %v540_v21, %v1892_v13  ;;  %v315_v29 = vpop.f32.mrf.mxu0  ;;  %v571_v21 = vand.u32 2147483647, %v561_v14 }
  0xd3   :  { %v1901_v35 = vadd.f32 %v315_v29, %v136_v46 }
  0xd4   :  { %v577_v27 = vadd.f32 %v541_v22, %v333_v20  ;;  %v1910_v20 = vperm.slane %v1243_v44, 2  ;;  %vm572_vm3 = vcmp.eq.f32.partialorder %v571_v21, 8.507059e+37 }
  0xd5   :  { %v368_v22 = vpop.f32.mrf.mxu2 }
  0xd6   :  { %v1453_v33 = vmul.f32 -1.442695, %v577_v27  ;;  %v1913_v24 = vadd.f32 %v368_v22, %v1894_v16  ;;  %v570_v27 = vsel %vm569_vm2, %v1534_v36, %v566_v0 }
  0xd8   :  { %1535 = vpow2.f32 %v1453_v33 }
  0xd9   :  { %v542_v37 = vpop.f32.mrf.mxu3 }
  0xda   :  { %v318_v9 = vpop.f32.mrf.mxu0  ;;  %v362_v37 = vadd.f32 %v361_v63, %v1894_v16 }
  0xdb   :  { %v1903_v41 = vadd.f32 %v318_v9, %v136_v46 }
  0xdd   :  { %2160 = vst [vmem:[#allocation10_spill] sm:$0xff] %v1903_v41  ;;  %v371_v53 = vpop.f32.mrf.mxu2 }
  0xde   :  { %v1536_v26 = vpop.eup %1535  ;;  %v1918_v36 = vadd.f32 %v371_v53, %v1894_v16 }
  0xdf   :  { %v581_v47 = vadd.f32 1.0, %v1536_v26 }
  0xe1   :  { %1537 = vrcp.f32 %v581_v47  ;;  %vm587_vm4 = vweird.f32 %v581_v47  ;;  %v593_v14 = vand.u32 2147483648, %v581_v47  ;;  %v591_v48 = vand.u32 2147483647, %v581_v47 }
  0xe2   :  { %v320_v54 = vpop.f32.mrf.mxu0 }
  0xe3   :  { %v1908_v57 = vadd.f32 %v320_v54, %v136_v46  ;;  %v574_v46 = vor.u32 1.1754944e-38, %v573_v4  ;;  %vm592_vm7 = vcmp.eq.f32.partialorder %v591_v48, 8.507059e+37 }
  0xe5   :  { %2161 = vst [vmem:[#allocation11_spill] sm:$0xff] %v1908_v57  ;;  %v575_v9 = vsel %vm572_vm3, %v574_v46, %v570_v27  ;;  %v373_v21 = vpop.f32.mrf.mxu2  ;;  %v334_v46 = vpop.f32.mrf.mxu1 }
  0xe7   :  { %v1538_v60 = vpop.eup %1537 }
  0xe8   :  { %v583_v61 = vmul.f32 %v1538_v60, %v581_v47  ;;  %vm588_vm5 = vweird.f32 %v1538_v60  ;;  %v1922_v47 = vadd.f32 %v373_v21, %v1894_v16 }
  0xe9   :  { %vm589_vm6 = vmor %vm587_vm4, %vm588_vm5 }
  0xea   :  { %v584_v5 = vsub.f32 1.0, %v583_v61  ;;  %v553_v33 = vpop.f32.mrf.mxu0  ;;  %v594_v61 = vor.u32 1.1754944e-38, %v593_v14 }
  0xeb   :  { %v554_v40 = vadd.f32 %v553_v33, %v1910_v20 }
  0xec   :  { %v585_v29 = vmul.f32 %v1538_v60, %v584_v5 }
  0xed   :  { %v597_v44 = vmul.f32 %v575_v9, %v554_v40  ;;  %v376_v33 = vpop.f32.mrf.mxu2 }
  0xee   :  { %v586_v26 = vadd.f32 %v1538_v60, %v585_v29 }
  0xef   :  { %v598_v51 = vadd.f32 %v597_v44, %v362_v37  ;;  %v1959_v37 = vpop.f32.mrf.mxu1 }
  0xf0   :  { %v590_v54 = vsel %vm589_vm6, %v1538_v60, %v586_v26 }
  0xf1   :  { %1539 = vtanh.f32 %v598_v51  ;;  %v595_v0 = vsel %vm592_vm7, %v594_v61, %v590_v54 }
  0xf2   :  { %v555_v63 = vpop.f32.mrf.mxu0  ;;  %v600_v4 = vsub.f32 1.0, %v595_v0  ;;  %v602_v27 = vmul.f32 %v595_v0, %v1739_v10  ;;  %v1934_v10 = vadd.f32 %v376_v33, %v1894_v16  ;;  %v335_v0 = vadd.f32 %v334_v46, %v1888_v1 }
  0xf4   :  { %2162 = vst [vmem:[#allocation12_spill] sm:$0xff] %v1934_v10 }
  0xf5   :  { %v1971_v48 = vpop.f32.mrf.mxu2 }
  0xf6   :  { %2164 = vst [vmem:[#allocation14_spill] sm:$0xff] %v1971_v48 }
  0xf7   :  { %v1540_v5 = vpop.eup %1539  ;;  %v1961_v40 = vpop.f32.mrf.mxu1 }
  0xf8   :  { %v601_v22 = vmul.f32 %v1540_v5, %v600_v4 }
  0xfa   :  { %v1924_v29 = vadd.f32 %v602_v27, %v601_v22 }
  0xfc   :  { %604 = vst [vmem:[%s2156_s5] sm:$0xff] %v1924_v29  ;;  %v605_v60 = vpack.c.bf16 %v1924_v29, %v1924_v29 }
  0xfe   :  { %614 = vmatmul.bf16.vlgmr.msrb.gmra.mxu1 %v605_v60  ;;  %627 = vmatmul.bf16.vlgmr.msrb.gmra.mxu2 %v605_v60 }
  0xff   :  { %640 = vmatmul.bf16.vlgmr.msra.gmra.mxu3 %v605_v60  ;;  %810 = vmatpush.bf16.msrb.mxu1 %v1741_v12  ;;  %v1963_v9 = vpop.f32.mrf.mxu1 }
 0x100   :  { %873 = vmatpush.bf16.msrb.mxu2 %v1708_v7  ;;  %886 = vmatpush.bf16.msra.mxu3 %v1743_v15 }
 0x103   :  { %811 = vmatpush.bf16.msrb.mxu1 %v1751_v28 }
 0x104   :  { %874 = vmatpush.bf16.msrb.mxu2 %v1711_v11  ;;  %887 = vmatpush.bf16.msra.mxu3 %v1754_v30 }
 0x107   :  { %812 = vmatpush.bf16.msrb.mxu1 %v1759_v42  ;;  %v1965_v26 = vpop.f32.mrf.mxu1 }
 0x108   :  { %875 = vmatpush.bf16.msrb.mxu2 %v1714_v17  ;;  %888 = vmatpush.bf16.msra.mxu3 %v1762_v43 }
 0x10b   :  { %813 = vmatpush.bf16.msrb.mxu1 %v1765_v55 }
 0x10c   :  { %876 = vmatpush.bf16.msrb.mxu2 %v1717_v23  ;;  %889 = vmatpush.bf16.msra.mxu3 %v1768_v56 }
 0x10f   :  { %814 = vmatpush.bf16.msrb.mxu1 %v1771_v2  ;;  %v1967_v44 = vpop.f32.mrf.mxu1 }
 0x110   :  { %877 = vmatpush.bf16.msrb.mxu2 %v1720_v34  ;;  %890 = vmatpush.bf16.msra.mxu3 %v1774_v3 }
 0x113   :  { %815 = vmatpush.bf16.msrb.mxu1 %v1782_v18 }
 0x114   :  { %878 = vmatpush.bf16.msrb.mxu2 %v1723_v45  ;;  %891 = vmatpush.bf16.msra.mxu3 %v1785_v19 }
 0x117   :  { %816 = vmatpush.bf16.msrb.mxu1 %v1789_v31  ;;  %v1969_v14 = vpop.f32.mrf.mxu1 }
 0x118   :  { %879 = vmatpush.bf16.msrb.mxu2 %v1726_v58  ;;  %892 = vmatpush.bf16.msra.mxu3 %v1792_v32  ;;  %2163 = vst [vmem:[#allocation13_spill] sm:$0xff] %v1969_v14 }
 0x11b   :  { %817 = vmatpush.bf16.msrb.mxu1 %v1797_v38 }
 0x11c   :  { %880 = vmatpush.bf16.msrb.mxu2 %v1729_v8  ;;  %893 = vmatpush.bf16.msra.mxu3 %v1800_v39 }
 0x17b   :  { %v615_v51 = vpop.f32.mrf.mxu1 }
 0x17c   :  { %v616_v53 = vadd.f32 %v615_v51, %v1879_v49 }
 0x17e   :  { %v645_v54 = vadd.f32 %v616_v53, %v1881_v50 }
 0x180   :  { %v1454_v61 = vmul.f32 -1.442695, %v645_v54 }
 0x181   :  { %v628_v63 = vpop.f32.mrf.mxu2 }
 0x182   :  { %1541 = vpow2.f32 %v1454_v61  ;;  %v629_v4 = vadd.f32 %v628_v63, %v1892_v13  ;;  %v641_v5 = vpop.f32.mrf.mxu3 }
 0x183   :  { %v617_v21 = vpop.f32.mrf.mxu1 }
 0x184   :  { %v665_v22 = vadd.f32 %v629_v4, %v335_v0 }
 0x186   :  { %v1455_v27 = vmul.f32 -1.442695, %v665_v22 }
 0x188   :  { %v1542_v60 = vpop.eup %1541  ;;  %1543 = vpow2.f32 %v1455_v27 }
 0x189   :  { %v649_v33 = vadd.f32 1.0, %v1542_v60  ;;  %v630_v48 = vpop.f32.mrf.mxu2 }
 0x18a   :  { %v643_v16 = vpop.f32.mrf.mxu3 }
 0x18b   :  { %1545 = vrcp.f32 %v649_v33  ;;  %v661_v46 = vand.u32 2147483648, %v649_v33  ;;  %v659_v63 = vand.u32 2147483647, %v649_v33  ;;  %vm655_vm9 = vweird.f32 %v649_v33 }
 0x18c   :  { %v642_v16 = vadd.f32 %v641_v5, %v1910_v20 }
 0x18d   :  { %v662_v4 = vor.u32 1.1754944e-38, %v661_v46  ;;  %vm660_vm11 = vcmp.eq.f32.partialorder %v659_v63, 8.507059e+37 }
 0x18e   :  { %v1544_v51 = vpop.eup %1543 }
 0x18f   :  { %v669_v57 = vadd.f32 1.0, %v1544_v51 }
 0x191   :  { %v1546_v50 = vpop.eup %1545  ;;  %1547 = vrcp.f32 %v669_v57  ;;  %v681_v51 = vand.u32 2147483648, %v669_v57  ;;  %v679_v10 = vand.u32 2147483647, %v669_v57  ;;  %vm675_vm13 = vweird.f32 %v669_v57 }
 0x192   :  { %v651_v53 = vmul.f32 %v1546_v50, %v649_v33  ;;  %vm656_vm8 = vweird.f32 %v1546_v50 }
 0x193   :  { %vm657_vm10 = vmor %vm655_vm9, %vm656_vm8  ;;  %vm680_vm15 = vcmp.eq.f32.partialorder %v679_v10, 8.507059e+37 }
 0x194   :  { %v652_v54 = vsub.f32 1.0, %v651_v53 }
 0x196   :  { %v653_v61 = vmul.f32 %v1546_v50, %v652_v54 }
 0x197   :  { %v1548_v14 = vpop.eup %1547 }
 0x198   :  { %v671_v21 = vmul.f32 %v1548_v14, %v669_v57  ;;  %v654_v0 = vadd.f32 %v1546_v50, %v653_v61  ;;  %vm676_vm12 = vweird.f32 %v1548_v14  ;;  %v682_v61 = vor.u32 1.1754944e-38, %v681_v51 }
 0x199   :  { %vm677_vm14 = vmor %vm675_vm13, %vm676_vm12 }
 0x19a   :  { %v672_v22 = vsub.f32 1.0, %v671_v21  ;;  %v658_v48 = vsel %vm657_vm10, %v1546_v50, %v654_v0 }
 0x19b   :  { %v663_v27 = vsel %vm660_vm11, %v662_v4, %v658_v48 }
 0x19c   :  { %v673_v60 = vmul.f32 %v1548_v14, %v672_v22  ;;  %v685_v53 = vmul.f32 %v663_v27, %v642_v16 }
 0x19e   :  { %v674_v54 = vadd.f32 %v1548_v14, %v673_v60  ;;  %v686_v41 = vadd.f32 %v685_v53, %v1899_v25 }
 0x1a0   :  { %v678_v33 = vsel %vm677_vm14, %v1548_v14, %v674_v54  ;;  %1549 = vtanh.f32 %v686_v41 }
 0x1a1   :  { %v683_v46 = vsel %vm680_vm15, %v682_v61, %v678_v33 }
 0x1a2   :  { %v688_v21 = vsub.f32 1.0, %v683_v46  ;;  %v690_v63 = vmul.f32 %v683_v46, %v1924_v29  ;;  %v338_v29 = vadd.f32 %v1959_v37, %v1888_v1 }
 0x1a6   :  { %v1550_v5 = vpop.eup %1549 }
 0x1a7   :  { %v689_v50 = vmul.f32 %v1550_v5, %v688_v21 }
 0x1a9   :  { %v1980_v0 = vadd.f32 %v690_v63, %v689_v50 }
 0x1ab   :  { %1456 = vst [vmem:[%s2156_s5 + $0x8] sm:$0xff] %v1980_v0  ;;  %v694_v25 = vpack.c.bf16 %v1980_v0, %v1980_v0 }
 0x1ad   :  { %703 = vmatmul.bf16.vlgmr.msra.gmra.mxu0 %v694_v25  ;;  %716 = vmatmul.bf16.vlgmr.msra.gmra.mxu1 %v694_v25 }
 0x1ae   :  { %729 = vmatmul.bf16.vlgmr.msra.gmra.mxu2 %v694_v25  ;;  %899 = vmatpush.bf16.msra.mxu0 %v1741_v12 }
 0x1af   :  { %962 = vmatpush.bf16.msra.mxu1 %v1708_v7  ;;  %975 = vmatpush.bf16.msra.mxu2 %v1743_v15 }
 0x1b2   :  { %900 = vmatpush.bf16.msra.mxu0 %v1751_v28 }
 0x1b3   :  { %963 = vmatpush.bf16.msra.mxu1 %v1711_v11  ;;  %976 = vmatpush.bf16.msra.mxu2 %v1754_v30 }
 0x1b6   :  { %901 = vmatpush.bf16.msra.mxu0 %v1759_v42 }
 0x1b7   :  { %964 = vmatpush.bf16.msra.mxu1 %v1714_v17  ;;  %977 = vmatpush.bf16.msra.mxu2 %v1762_v43 }
 0x1ba   :  { %902 = vmatpush.bf16.msra.mxu0 %v1765_v55 }
 0x1bb   :  { %965 = vmatpush.bf16.msra.mxu1 %v1717_v23  ;;  %978 = vmatpush.bf16.msra.mxu2 %v1768_v56 }
 0x1be   :  { %903 = vmatpush.bf16.msra.mxu0 %v1771_v2 }
 0x1bf   :  { %966 = vmatpush.bf16.msra.mxu1 %v1720_v34  ;;  %979 = vmatpush.bf16.msra.mxu2 %v1774_v3 }
 0x1c2   :  { %904 = vmatpush.bf16.msra.mxu0 %v1782_v18 }
 0x1c3   :  { %967 = vmatpush.bf16.msra.mxu1 %v1723_v45  ;;  %980 = vmatpush.bf16.msra.mxu2 %v1785_v19 }
 0x1c6   :  { %905 = vmatpush.bf16.msra.mxu0 %v1789_v31 }
 0x1c7   :  { %968 = vmatpush.bf16.msra.mxu1 %v1726_v58  ;;  %981 = vmatpush.bf16.msra.mxu2 %v1792_v32 }
 0x1ca   :  { %906 = vmatpush.bf16.msra.mxu0 %v1797_v38 }
 0x1cb   :  { %969 = vmatpush.bf16.msra.mxu1 %v1729_v8  ;;  %982 = vmatpush.bf16.msra.mxu2 %v1800_v39 }
 0x22a   :  { %v704_v41 = vpop.f32.mrf.mxu0  ;;  %v717_v57 = vpop.f32.mrf.mxu1 }
 0x22b   :  { %v705_v10 = vadd.f32 %v704_v41, %v1879_v49  ;;  %v718_v14 = vadd.f32 %v717_v57, %v1892_v13 }
 0x22d   :  { %v734_v4 = vadd.f32 %v705_v10, %v1884_v59  ;;  %v754_v22 = vadd.f32 %v718_v14, %v338_v29 }
 0x22f   :  { %v1457_v16 = vmul.f32 -1.442695, %v734_v4  ;;  %v1458_v48 = vmul.f32 -1.442695, %v754_v22 }
 0x231   :  { %1551 = vpow2.f32 %v1457_v16  ;;  %v730_v27 = vpop.f32.mrf.mxu2 }
 0x232   :  { %1553 = vpow2.f32 %v1458_v48  ;;  %v706_v60 = vpop.f32.mrf.mxu0  ;;  %v719_v51 = vpop.f32.mrf.mxu1  ;;  %v731_v4 = vadd.f32 %v730_v27, %v1910_v20 }
 0x237   :  { %v1552_v53 = vpop.eup %1551 }
 0x238   :  { %v1554_v54 = vpop.eup %1553  ;;  %v738_v61 = vadd.f32 1.0, %v1552_v53 }
 0x239   :  { %v758_v33 = vadd.f32 1.0, %v1554_v54  ;;  %v732_v46 = vpop.f32.mrf.mxu2 }
 0x23a   :  { %1555 = vrcp.f32 %v738_v61  ;;  %v750_v25 = vand.u32 2147483648, %v738_v61  ;;  %v748_v57 = vand.u32 2147483647, %v738_v61  ;;  %vm744_vm1 = vweird.f32 %v738_v61 }
 0x23b   :  { %1557 = vrcp.f32 %v758_v33  ;;  %v770_v60 = vand.u32 2147483648, %v758_v33  ;;  %vm764_vm5 = vweird.f32 %v758_v33  ;;  %v768_v53 = vand.u32 2147483647, %v758_v33 }
 0x23c   :  { %v751_v14 = vor.u32 1.1754944e-38, %v750_v25  ;;  %vm749_vm3 = vcmp.eq.f32.partialorder %v748_v57, 8.507059e+37 }
 0x23d   :  { %vm769_vm7 = vcmp.eq.f32.partialorder %v768_v53, 8.507059e+37 }
 0x240   :  { %v1556_v37 = vpop.eup %1555 }
 0x241   :  { %v1558_v21 = vpop.eup %1557  ;;  %v740_v5 = vmul.f32 %v1556_v37, %v738_v61  ;;  %vm745_vm0 = vweird.f32 %v1556_v37 }
 0x242   :  { %v760_v50 = vmul.f32 %v1558_v21, %v758_v33  ;;  %vm746_vm2 = vmor %vm744_vm1, %vm745_vm0  ;;  %vm765_vm4 = vweird.f32 %v1558_v21  ;;  %v340_v33 = vadd.f32 %v1961_v40, %v1888_v1 }
 0x243   :  { %v741_v59 = vsub.f32 1.0, %v740_v5  ;;  %vm766_vm6 = vmor %vm764_vm5, %vm765_vm4  ;;  %v771_v5 = vor.u32 1.1754944e-38, %v770_v60 }
 0x244   :  { %v761_v63 = vsub.f32 1.0, %v760_v50 }
 0x245   :  { %v742_v41 = vmul.f32 %v1556_v37, %v741_v59 }
 0x246   :  { %v762_v29 = vmul.f32 %v1558_v21, %v761_v63 }
 0x247   :  { %v743_v10 = vadd.f32 %v1556_v37, %v742_v41 }
 0x248   :  { %v763_v48 = vadd.f32 %v1558_v21, %v762_v29 }
 0x249   :  { %v747_v22 = vsel %vm746_vm2, %v1556_v37, %v743_v10 }
 0x24a   :  { %v752_v16 = vsel %vm749_vm3, %v751_v14, %v747_v22  ;;  %v767_v46 = vsel %vm766_vm6, %v1558_v21, %v763_v48 }
 0x24b   :  { %v774_v51 = vmul.f32 %v752_v16, %v731_v4  ;;  %v772_v61 = vsel %vm769_vm7, %v771_v5, %v767_v46 }
 0x24c   :  { %v777_v50 = vsub.f32 1.0, %v772_v61  ;;  %v779_v37 = vmul.f32 %v772_v61, %v1980_v0 }
 0x24d   :  { %v775_v54 = vadd.f32 %v774_v51, %v1906_v52 }
 0x24f   :  { %1559 = vtanh.f32 %v775_v54 }
 0x255   :  { %v1560_v59 = vpop.eup %1559 }
 0x256   :  { %v778_v27 = vmul.f32 %v1560_v59, %v777_v50 }
 0x258   :  { %v2020_v63 = vadd.f32 %v779_v37, %v778_v27 }
 0x25a   :  { %1459 = vst [vmem:[%s2156_s5 + $0x10] sm:$0xff] %v2020_v63  ;;  %v783_v52 = vpack.c.bf16 %v2020_v63, %v2020_v63 }
 0x25c   :  { %792 = vmatmul.bf16.vlgmr.msrb.gmra.mxu3 %v783_v52  ;;  %805 = vmatmul.bf16.vlgmr.msrb.gmra.mxu0 %v783_v52 }
 0x25d   :  { %818 = vmatmul.bf16.vlgmr.msrb.gmra.mxu1 %v783_v52  ;;  %988 = vmatpush.bf16.msrb.mxu3 %v1741_v12 }
 0x25e   :  { %1051 = vmatpush.bf16.msrb.mxu0 %v1708_v7  ;;  %1064 = vmatpush.bf16.msrb.mxu1 %v1743_v15 }
 0x261   :  { %989 = vmatpush.bf16.msrb.mxu3 %v1751_v28 }
 0x262   :  { %1052 = vmatpush.bf16.msrb.mxu0 %v1711_v11  ;;  %1065 = vmatpush.bf16.msrb.mxu1 %v1754_v30 }
 0x265   :  { %990 = vmatpush.bf16.msrb.mxu3 %v1759_v42 }
 0x266   :  { %1053 = vmatpush.bf16.msrb.mxu0 %v1714_v17  ;;  %1066 = vmatpush.bf16.msrb.mxu1 %v1762_v43 }
 0x269   :  { %991 = vmatpush.bf16.msrb.mxu3 %v1765_v55 }
 0x26a   :  { %1054 = vmatpush.bf16.msrb.mxu0 %v1717_v23  ;;  %1067 = vmatpush.bf16.msrb.mxu1 %v1768_v56 }
 0x26d   :  { %992 = vmatpush.bf16.msrb.mxu3 %v1771_v2 }
 0x26e   :  { %1055 = vmatpush.bf16.msrb.mxu0 %v1720_v34  ;;  %1068 = vmatpush.bf16.msrb.mxu1 %v1774_v3 }
 0x271   :  { %993 = vmatpush.bf16.msrb.mxu3 %v1782_v18 }
 0x272   :  { %1056 = vmatpush.bf16.msrb.mxu0 %v1723_v45  ;;  %1069 = vmatpush.bf16.msrb.mxu1 %v1785_v19 }
 0x275   :  { %994 = vmatpush.bf16.msrb.mxu3 %v1789_v31 }
 0x276   :  { %1057 = vmatpush.bf16.msrb.mxu0 %v1726_v58  ;;  %1070 = vmatpush.bf16.msrb.mxu1 %v1792_v32 }
 0x279   :  { %995 = vmatpush.bf16.msrb.mxu3 %v1797_v38 }
 0x27a   :  { %1058 = vmatpush.bf16.msrb.mxu0 %v1729_v8  ;;  %1071 = vmatpush.bf16.msrb.mxu1 %v1800_v39 }
 0x2d9   :  { %v806_v0 = vpop.f32.mrf.mxu0 }
 0x2da   :  { %v807_v21 = vadd.f32 %v806_v0, %v1892_v13  ;;  %v819_v25 = vpop.f32.mrf.mxu1 }
 0x2dc   :  { %v843_v41 = vadd.f32 %v807_v21, %v340_v33  ;;  %v820_v21 = vadd.f32 %v819_v25, %v1910_v20 }
 0x2de   :  { %v1461_v57 = vmul.f32 -1.442695, %v843_v41 }
 0x2df   :  { %v793_v29 = vpop.f32.mrf.mxu3 }
 0x2e0   :  { %1561 = vpow2.f32 %v1461_v57  ;;  %v794_v10 = vadd.f32 %v793_v29, %v1879_v49 }
 0x2e1   :  { %v808_v14 = vpop.f32.mrf.mxu0 }
 0x2e2   :  { %v823_v4 = vadd.f32 %v794_v10, %v1886_v62  ;;  %v821_v22 = vpop.f32.mrf.mxu1 }
 0x2e4   :  { %v1460_v16 = vmul.f32 -1.442695, %v823_v4 }
 0x2e6   :  { %v1562_v48 = vpop.eup %1561  ;;  %1563 = vpow2.f32 %v1460_v16 }
 0x2e7   :  { %v847_v60 = vadd.f32 1.0, %v1562_v48  ;;  %v795_v51 = vpop.f32.mrf.mxu3 }
 0x2e9   :  { %1565 = vrcp.f32 %v847_v60  ;;  %v859_v10 = vand.u32 2147483648, %v847_v60  ;;  %vm853_vm13 = vweird.f32 %v847_v60  ;;  %v857_v4 = vand.u32 2147483647, %v847_v60 }
 0x2eb   :  { %v860_v48 = vor.u32 1.1754944e-38, %v859_v10  ;;  %vm858_vm15 = vcmp.eq.f32.partialorder %v857_v4, 8.507059e+37 }
 0x2ec   :  { %v1564_v40 = vpop.eup %1563 }
 0x2ed   :  { %v827_v53 = vadd.f32 1.0, %v1564_v40 }
 0x2ef   :  { %1567 = vrcp.f32 %v827_v53  ;;  %v1566_v54 = vpop.eup %1565  ;;  %v839_v27 = vand.u32 2147483648, %v827_v53  ;;  %v837_v62 = vand.u32 2147483647, %v827_v53  ;;  %vm833_vm9 = vweird.f32 %v827_v53 }
 0x2f0   :  { %v849_v46 = vmul.f32 %v1566_v54, %v847_v60  ;;  %vm854_vm12 = vweird.f32 %v1566_v54 }
 0x2f1   :  { %v840_v33 = vor.u32 1.1754944e-38, %v839_v27  ;;  %vm838_vm11 = vcmp.eq.f32.partialorder %v837_v62, 8.507059e+37  ;;  %vm855_vm14 = vmor %vm853_vm13, %vm854_vm12 }
 0x2f2   :  { %v850_v50 = vsub.f32 1.0, %v849_v46 }
 0x2f4   :  { %v851_v52 = vmul.f32 %v1566_v54, %v850_v50 }
 0x2f5   :  { %v1568_v5 = vpop.eup %1567 }
 0x2f6   :  { %v829_v61 = vmul.f32 %v1568_v5, %v827_v53  ;;  %vm834_vm8 = vweird.f32 %v1568_v5  ;;  %v852_v29 = vadd.f32 %v1566_v54, %v851_v52 }
 0x2f7   :  { %vm835_vm10 = vmor %vm833_vm9, %vm834_vm8 }
 0x2f8   :  { %v830_v59 = vsub.f32 1.0, %v829_v61  ;;  %v856_v16 = vsel %vm855_vm14, %v1566_v54, %v852_v29 }
 0x2f9   :  { %v861_v51 = vsel %vm858_vm15, %v860_v48, %v856_v16 }
 0x2fa   :  { %v831_v37 = vmul.f32 %v1568_v5, %v830_v59  ;;  %v866_v40 = vsub.f32 1.0, %v861_v51  ;;  %v868_v46 = vmul.f32 %v861_v51, %v2020_v63 }
 0x2fc   :  { %v832_v0 = vadd.f32 %v1568_v5, %v831_v37 }
 0x2fe   :  { %v836_v41 = vsel %vm835_vm10, %v1568_v5, %v832_v0 }
 0x2ff   :  { %v841_v57 = vsel %vm838_vm11, %v840_v33, %v836_v41 }
 0x300   :  { %v863_v14 = vmul.f32 %v841_v57, %v820_v21 }
 0x302   :  { %v864_v22 = vadd.f32 %v863_v14, %v1913_v24 }
 0x304   :  { %1569 = vtanh.f32 %v864_v22 }
 0x30a   :  { %v1570_v53 = vpop.eup %1569 }
 0x30b   :  { %v867_v25 = vmul.f32 %v1570_v53, %v866_v40 }
 0x30d   :  { %v2060_v5 = vadd.f32 %v868_v46, %v867_v25 }
 0x30f   :  { %1462 = vst [vmem:[%s2156_s5 + $0x18] sm:$0xff] %v2060_v5  ;;  %v872_v24 = vpack.c.bf16 %v2060_v5, %v2060_v5 }
 0x311   :  { %881 = vmatmul.bf16.vlgmr.msrb.gmra.mxu2 %v872_v24  ;;  %894 = vmatmul.bf16.vlgmr.msra.gmra.mxu3 %v872_v24 }
 0x312   :  { %907 = vmatmul.bf16.vlgmr.msra.gmra.mxu0 %v872_v24  ;;  %1077 = vmatpush.bf16.msrb.mxu2 %v1741_v12 }
 0x313   :  { %1140 = vmatpush.bf16.msra.mxu3 %v1708_v7  ;;  %1153 = vmatpush.bf16.msra.mxu0 %v1743_v15 }
 0x316   :  { %1078 = vmatpush.bf16.msrb.mxu2 %v1751_v28 }
 0x317   :  { %1141 = vmatpush.bf16.msra.mxu3 %v1711_v11  ;;  %1154 = vmatpush.bf16.msra.mxu0 %v1754_v30 }
 0x31a   :  { %1079 = vmatpush.bf16.msrb.mxu2 %v1759_v42 }
 0x31b   :  { %1142 = vmatpush.bf16.msra.mxu3 %v1714_v17  ;;  %1155 = vmatpush.bf16.msra.mxu0 %v1762_v43 }
 0x31e   :  { %1080 = vmatpush.bf16.msrb.mxu2 %v1765_v55 }
 0x31f   :  { %1143 = vmatpush.bf16.msra.mxu3 %v1717_v23  ;;  %1156 = vmatpush.bf16.msra.mxu0 %v1768_v56  ;;  %v343_v23 = vadd.f32 %v1963_v9, %v1888_v1 }
 0x322   :  { %1081 = vmatpush.bf16.msrb.mxu2 %v1771_v2 }
 0x323   :  { %1144 = vmatpush.bf16.msra.mxu3 %v1720_v34  ;;  %1157 = vmatpush.bf16.msra.mxu0 %v1774_v3 }
 0x326   :  { %1082 = vmatpush.bf16.msrb.mxu2 %v1782_v18 }
 0x327   :  { %1145 = vmatpush.bf16.msra.mxu3 %v1723_v45  ;;  %1158 = vmatpush.bf16.msra.mxu0 %v1785_v19 }
 0x32a   :  { %1083 = vmatpush.bf16.msrb.mxu2 %v1789_v31 }
 0x32b   :  { %1146 = vmatpush.bf16.msra.mxu3 %v1726_v58  ;;  %1159 = vmatpush.bf16.msra.mxu0 %v1792_v32 }
 0x32e   :  { %1084 = vmatpush.bf16.msrb.mxu2 %v1797_v38 }
 0x32f   :  { %1147 = vmatpush.bf16.msra.mxu3 %v1729_v8  ;;  %1160 = vmatpush.bf16.msra.mxu0 %v1800_v39 }
 0x38f   :  { %v908_v7 = vpop.f32.mrf.mxu0 }
 0x390   :  { %v909_v33 = vadd.f32 %v908_v7, %v1910_v20 }
 0x394   :  { %v882_v11 = vpop.f32.mrf.mxu2  ;;  %v895_v17 = vpop.f32.mrf.mxu3 }
 0x395   :  { %v883_v34 = vadd.f32 %v882_v11, %v1879_v49  ;;  %v896_v45 = vadd.f32 %v895_v17, %v1892_v13 }
 0x397   :  { %v912_v58 = vadd.f32 %v883_v34, %v1890_v6  ;;  %v932_v15 = vadd.f32 %v896_v45, %v343_v23  ;;  %v910_v30 = vpop.f32.mrf.mxu0 }
 0x399   :  { %v1463_v43 = vmul.f32 -1.442695, %v912_v58  ;;  %v1464_v56 = vmul.f32 -1.442695, %v932_v15 }
 0x39b   :  { %1571 = vpow2.f32 %v1463_v43 }
 0x39c   :  { %1573 = vpow2.f32 %v1464_v56  ;;  %v884_v8 = vpop.f32.mrf.mxu2  ;;  %v897_v3 = vpop.f32.mrf.mxu3 }
 0x3a1   :  { %v1572_v19 = vpop.eup %1571 }
 0x3a2   :  { %v1574_v32 = vpop.eup %1573  ;;  %v916_v39 = vadd.f32 1.0, %v1572_v19 }
 0x3a3   :  { %v936_v63 = vadd.f32 1.0, %v1574_v32 }
 0x3a4   :  { %1575 = vrcp.f32 %v916_v39  ;;  %v928_v6 = vand.u32 2147483648, %v916_v39  ;;  %v926_v37 = vand.u32 2147483647, %v916_v39  ;;  %vm922_vm1 = vweird.f32 %v916_v39 }
 0x3a5   :  { %1577 = vrcp.f32 %v936_v63  ;;  %v948_v10 = vand.u32 2147483648, %v936_v63  ;;  %vm942_vm5 = vweird.f32 %v936_v63  ;;  %v946_v14 = vand.u32 2147483647, %v936_v63 }
 0x3a6   :  { %v929_v0 = vor.u32 1.1754944e-38, %v928_v6  ;;  %vm927_vm3 = vcmp.eq.f32.partialorder %v926_v37, 8.507059e+37 }
 0x3a7   :  { %v949_v16 = vor.u32 1.1754944e-38, %v948_v10  ;;  %vm947_vm7 = vcmp.eq.f32.partialorder %v946_v14, 8.507059e+37  ;;  %v348_v14 = vadd.f32 %v1967_v44, %v1888_v1 }
 0x3aa   :  { %v1576_v9 = vpop.eup %1575 }
 0x3ab   :  { %v1578_v60 = vpop.eup %1577  ;;  %v918_v54 = vmul.f32 %v1576_v9, %v916_v39  ;;  %vm923_vm0 = vweird.f32 %v1576_v9 }
 0x3ac   :  { %v938_v61 = vmul.f32 %v1578_v60, %v936_v63  ;;  %vm924_vm2 = vmor %vm922_vm1, %vm923_vm0  ;;  %vm943_vm4 = vweird.f32 %v1578_v60 }
 0x3ad   :  { %v919_v50 = vsub.f32 1.0, %v918_v54  ;;  %vm944_vm6 = vmor %vm942_vm5, %vm943_vm4 }
 0x3ae   :  { %v939_v59 = vsub.f32 1.0, %v938_v61 }
 0x3af   :  { %v920_v27 = vmul.f32 %v1576_v9, %v919_v50 }
 0x3b0   :  { %v940_v62 = vmul.f32 %v1578_v60, %v939_v59 }
 0x3b1   :  { %v921_v52 = vadd.f32 %v1576_v9, %v920_v27 }
 0x3b2   :  { %v941_v57 = vadd.f32 %v1578_v60, %v940_v62 }
 0x3b3   :  { %v925_v21 = vsel %vm924_vm2, %v1576_v9, %v921_v52 }
 0x3b4   :  { %v930_v41 = vsel %vm927_vm3, %v929_v0, %v925_v21  ;;  %v945_v22 = vsel %vm944_vm6, %v1578_v60, %v941_v57 }
 0x3b5   :  { %v952_v29 = vmul.f32 %v930_v41, %v909_v33  ;;  %v950_v48 = vsel %vm947_vm7, %v949_v16, %v945_v22  ;;  %v2165_v16 = vld [vmem:[#allocation10_spill] sm:$0xff] }
 0x3b6   :  { %v955_v51 = vsub.f32 1.0, %v950_v48  ;;  %v957_v25 = vmul.f32 %v950_v48, %v2060_v5 }
 0x3b7   :  { %v953_v4 = vadd.f32 %v952_v29, %v1918_v36 }
 0x3b9   :  { %1579 = vtanh.f32 %v953_v4 }
 0x3bf   :  { %v1580_v40 = vpop.eup %1579 }
 0x3c0   :  { %v956_v53 = vmul.f32 %v1580_v40, %v955_v51 }
 0x3c2   :  { %v2100_v46 = vadd.f32 %v957_v25, %v956_v53 }
 0x3c4   :  { %1465 = vst [vmem:[%s2156_s5 + $0x20] sm:$0xff] %v2100_v46  ;;  %v961_v36 = vpack.c.bf16 %v2100_v46, %v2100_v46 }
 0x3c6   :  { %970 = vmatmul.bf16.vlgmr.msra.gmra.mxu1 %v961_v36  ;;  %983 = vmatmul.bf16.vlgmr.msra.gmra.mxu2 %v961_v36 }
 0x3c7   :  { %996 = vmatmul.bf16.vlgmr.msrb.gmra.mxu3 %v961_v36  ;;  %1166 = vmatpush.bf16.msra.mxu1 %v1741_v12 }
 0x3cb   :  { %1167 = vmatpush.bf16.msra.mxu1 %v1751_v28  ;;  %v345_v28 = vadd.f32 %v1965_v26, %v1888_v1 }
 0x3cf   :  { %1168 = vmatpush.bf16.msra.mxu1 %v1759_v42 }
 0x3d3   :  { %1169 = vmatpush.bf16.msra.mxu1 %v1765_v55 }
 0x3d7   :  { %1170 = vmatpush.bf16.msra.mxu1 %v1771_v2 }
 0x3db   :  { %1171 = vmatpush.bf16.msra.mxu1 %v1782_v18 }
 0x3df   :  { %1172 = vmatpush.bf16.msra.mxu1 %v1789_v31 }
 0x3e3   :  { %1173 = vmatpush.bf16.msra.mxu1 %v1797_v38 }
 0x443   :  { %v971_v5 = vpop.f32.mrf.mxu1 }
 0x444   :  { %v972_v24 = vadd.f32 %v971_v5, %v1879_v49 }
 0x446   :  { %v1001_v7 = vadd.f32 %v972_v24, %v1901_v35 }
 0x448   :  { %v1466_v12 = vmul.f32 -1.442695, %v1001_v7 }
 0x449   :  { %v984_v11 = vpop.f32.mrf.mxu2 }
 0x44a   :  { %1581 = vpow2.f32 %v1466_v12  ;;  %v985_v42 = vadd.f32 %v984_v11, %v1892_v13  ;;  %v997_v55 = vpop.f32.mrf.mxu3 }
 0x44b   :  { %v973_v2 = vpop.f32.mrf.mxu1  ;;  %v998_v63 = vadd.f32 %v997_v55, %v1910_v20 }
 0x44c   :  { %v1021_v18 = vadd.f32 %v985_v42, %v345_v28 }
 0x44e   :  { %v1467_v17 = vmul.f32 -1.442695, %v1021_v18 }
 0x450   :  { %v1582_v31 = vpop.eup %1581  ;;  %1583 = vpow2.f32 %v1467_v17 }
 0x451   :  { %v1005_v38 = vadd.f32 1.0, %v1582_v31  ;;  %v986_v23 = vpop.f32.mrf.mxu2 }
 0x452   :  { %v999_v34 = vpop.f32.mrf.mxu3 }
 0x453   :  { %1585 = vrcp.f32 %v1005_v38  ;;  %v1017_v26 = vand.u32 2147483648, %v1005_v38  ;;  %v1015_v56 = vand.u32 2147483647, %v1005_v38  ;;  %vm1011_vm9 = vweird.f32 %v1005_v38 }
 0x455   :  { %v1018_v32 = vor.u32 1.1754944e-38, %v1017_v26  ;;  %vm1016_vm11 = vcmp.eq.f32.partialorder %v1015_v56, 8.507059e+37 }
 0x456   :  { %v1584_v45 = vpop.eup %1583 }
 0x457   :  { %v1025_v35 = vadd.f32 1.0, %v1584_v45 }
 0x459   :  { %v1586_v58 = vpop.eup %1585  ;;  %1587 = vrcp.f32 %v1025_v35  ;;  %v1037_v61 = vand.u32 2147483648, %v1025_v35  ;;  %v1035_v6 = vand.u32 2147483647, %v1025_v35  ;;  %vm1031_vm13 = vweird.f32 %v1025_v35 }
 0x45a   :  { %v1007_v15 = vmul.f32 %v1586_v58, %v1005_v38  ;;  %vm1012_vm8 = vweird.f32 %v1586_v58 }
 0x45b   :  { %vm1013_vm10 = vmor %vm1011_vm9, %vm1012_vm8  ;;  %v1038_v37 = vor.u32 1.1754944e-38, %v1037_v61  ;;  %vm1036_vm15 = vcmp.eq.f32.partialorder %v1035_v6, 8.507059e+37 }
 0x45c   :  { %v1008_v30 = vsub.f32 1.0, %v1007_v15 }
 0x45e   :  { %v1009_v43 = vmul.f32 %v1586_v58, %v1008_v30 }
 0x45f   :  { %v1588_v8 = vpop.eup %1587 }
 0x460   :  { %v1027_v3 = vmul.f32 %v1588_v8, %v1025_v35  ;;  %v1010_v19 = vadd.f32 %v1586_v58, %v1009_v43  ;;  %vm1032_vm12 = vweird.f32 %v1588_v8 }
 0x461   :  { %vm1033_vm14 = vmor %vm1031_vm13, %vm1032_vm12 }
 0x462   :  { %v1028_v39 = vsub.f32 1.0, %v1027_v3  ;;  %v1014_v9 = vsel %vm1013_vm10, %v1586_v58, %v1010_v19 }
 0x463   :  { %v1019_v60 = vsel %vm1016_vm11, %v1018_v32, %v1014_v9 }
 0x464   :  { %v1029_v54 = vmul.f32 %v1588_v8, %v1028_v39  ;;  %v1041_v50 = vmul.f32 %v1019_v60, %v998_v63 }
 0x466   :  { %v1030_v59 = vadd.f32 %v1588_v8, %v1029_v54  ;;  %v1042_v27 = vadd.f32 %v1041_v50, %v1922_v47 }
 0x468   :  { %v1034_v62 = vsel %vm1033_vm14, %v1588_v8, %v1030_v59  ;;  %1589 = vtanh.f32 %v1042_v27  ;;  %v2166_v8 = vld [vmem:[#allocation12_spill] sm:$0xff]  ;;  %v2167_v59 = vld [vmem:[#allocation13_spill] sm:$0xff] }
 0x469   :  { %v1039_v52 = vsel %vm1036_vm15, %v1038_v37, %v1034_v62  ;;  %v350_v27 = vadd.f32 %v2167_v59, %v1888_v1 }
 0x46a   :  { %v1044_v0 = vsub.f32 1.0, %v1039_v52  ;;  %v1046_v41 = vmul.f32 %v1039_v52, %v2100_v46 }
 0x46e   :  { %v1590_v33 = vpop.eup %1589 }
 0x46f   :  { %v1045_v21 = vmul.f32 %v1590_v33, %v1044_v0 }
 0x471   :  { %v1047_v57 = vadd.f32 %v1046_v41, %v1045_v21 }
 0x473   :  { %1468 = vst [vmem:[%s2156_s5 + $0x28] sm:$0xff] %v1047_v57  ;;  %v1050_v29 = vpack.c.bf16 %v1047_v57, %v1047_v57 }
 0x475   :  { %1059 = vmatmul.bf16.vlgmr.msrb.gmra.mxu0 %v1050_v29  ;;  %1072 = vmatmul.bf16.vlgmr.msrb.gmra.mxu1 %v1050_v29 }
 0x476   :  { %1085 = vmatmul.bf16.vlgmr.msrb.gmra.mxu2 %v1050_v29 }
 0x4f2   :  { %v1060_v47 = vpop.f32.mrf.mxu0  ;;  %v1073_v10 = vpop.f32.mrf.mxu1 }
 0x4f3   :  { %v1061_v4 = vadd.f32 %v1060_v47, %v1879_v49  ;;  %v1074_v22 = vadd.f32 %v1073_v10, %v1892_v13 }
 0x4f5   :  { %v1090_v48 = vadd.f32 %v1061_v4, %v2165_v16  ;;  %v1110_v51 = vadd.f32 %v1074_v22, %v348_v14 }
 0x4f7   :  { %v1469_v40 = vmul.f32 -1.442695, %v1090_v48  ;;  %v1470_v53 = vmul.f32 -1.442695, %v1110_v51 }
 0x4f9   :  { %1591 = vpow2.f32 %v1469_v40  ;;  %v1086_v25 = vpop.f32.mrf.mxu2 }
 0x4fa   :  { %1593 = vpow2.f32 %v1470_v53  ;;  %v1062_v46 = vpop.f32.mrf.mxu0  ;;  %v1075_v36 = vpop.f32.mrf.mxu1  ;;  %v1087_v35 = vadd.f32 %v1086_v25, %v1910_v20 }
 0x4ff   :  { %v1592_v5 = vpop.eup %1591 }
 0x500   :  { %v1594_v24 = vpop.eup %1593  ;;  %v1094_v7 = vadd.f32 1.0, %v1592_v5 }
 0x501   :  { %v1114_v12 = vadd.f32 1.0, %v1594_v24  ;;  %v1088_v11 = vpop.f32.mrf.mxu2 }
 0x502   :  { %1595 = vrcp.f32 %v1094_v7  ;;  %v1106_v17 = vand.u32 2147483648, %v1094_v7  ;;  %v1104_v38 = vand.u32 2147483647, %v1094_v7  ;;  %vm1100_vm1 = vweird.f32 %v1094_v7 }
 0x503   :  { %1597 = vrcp.f32 %v1114_v12  ;;  %v1126_v26 = vand.u32 2147483648, %v1114_v12  ;;  %vm1120_vm5 = vweird.f32 %v1114_v12  ;;  %v1124_v56 = vand.u32 2147483647, %v1114_v12 }
 0x504   :  { %v1107_v45 = vor.u32 1.1754944e-38, %v1106_v17  ;;  %vm1105_vm3 = vcmp.eq.f32.partialorder %v1104_v38, 8.507059e+37 }
 0x505   :  { %v1127_v32 = vor.u32 1.1754944e-38, %v1126_v26  ;;  %vm1125_vm7 = vcmp.eq.f32.partialorder %v1124_v56, 8.507059e+37 }
 0x508   :  { %v1596_v44 = vpop.eup %1595 }
 0x509   :  { %v1598_v28 = vpop.eup %1597  ;;  %v1096_v42 = vmul.f32 %v1596_v44, %v1094_v7  ;;  %vm1101_vm0 = vweird.f32 %v1596_v44 }
 0x50a   :  { %v1116_v55 = vmul.f32 %v1598_v28, %v1114_v12  ;;  %vm1102_vm2 = vmor %vm1100_vm1, %vm1101_vm0  ;;  %vm1121_vm4 = vweird.f32 %v1598_v28 }
 0x50b   :  { %v1097_v2 = vsub.f32 1.0, %v1096_v42  ;;  %vm1122_vm6 = vmor %vm1120_vm5, %vm1121_vm4  ;;  %v2169_v42 = vld [vmem:[#allocation9_spill] sm:$0xff] }
 0x50c   :  { %v1117_v18 = vsub.f32 1.0, %v1116_v55  ;;  %v2170_v55 = vld [vmem:[#allocation14_spill] sm:$0xff] }
 0x50d   :  { %v1098_v31 = vmul.f32 %v1596_v44, %v1097_v2  ;;  %v379_v2 = vadd.f32 %v2170_v55, %v2169_v42 }
 0x50e   :  { %v1118_v23 = vmul.f32 %v1598_v28, %v1117_v18 }
 0x50f   :  { %v1099_v34 = vadd.f32 %v1596_v44, %v1098_v31 }
 0x510   :  { %v1119_v30 = vadd.f32 %v1598_v28, %v1118_v23 }
 0x511   :  { %v1103_v58 = vsel %vm1102_vm2, %v1596_v44, %v1099_v34 }
 0x512   :  { %v1108_v15 = vsel %vm1105_vm3, %v1107_v45, %v1103_v58  ;;  %v1123_v19 = vsel %vm1122_vm6, %v1598_v28, %v1119_v30 }
 0x513   :  { %v1130_v43 = vmul.f32 %v1108_v15, %v1087_v35  ;;  %v1128_v39 = vsel %vm1125_vm7, %v1127_v32, %v1123_v19 }
 0x514   :  { %v1133_v63 = vsub.f32 1.0, %v1128_v39  ;;  %v1135_v54 = vmul.f32 %v1128_v39, %v1047_v57  ;;  %v2168_v57 = vld [vmem:[#allocation11_spill] sm:$0xff] }
 0x515   :  { %v1131_v3 = vadd.f32 %v1130_v43, %v2166_v8 }
 0x517   :  { %1599 = vtanh.f32 %v1131_v3 }
 0x51d   :  { %v1600_v9 = vpop.eup %1599 }
 0x51e   :  { %v1134_v60 = vmul.f32 %v1600_v9, %v1133_v63 }
 0x520   :  { %v1136_v61 = vadd.f32 %v1135_v54, %v1134_v60 }
 0x522   :  { %1471 = vst [vmem:[%s2156_s5 + $0x30] sm:$0xff] %v1136_v61  ;;  %v1139_v50 = vpack.c.bf16 %v1136_v61, %v1136_v61 }
 0x524   :  { %1148 = vmatmul.bf16.vlgmr.msra.gmra.mxu3 %v1139_v50  ;;  %1161 = vmatmul.bf16.vlgmr.msra.gmra.mxu0 %v1139_v50 }
 0x525   :  { %1174 = vmatmul.bf16.vlgmr.msra.gmra.mxu1 %v1139_v50 }
 0x5a1   :  { %v1162_v6 = vpop.f32.mrf.mxu0 }
 0x5a2   :  { %v1163_v37 = vadd.f32 %v1162_v6, %v1892_v13  ;;  %v1175_v62 = vpop.f32.mrf.mxu1 }
 0x5a3   :  { %v1176_v12 = vadd.f32 %v1175_v62, %v1910_v20 }
 0x5a4   :  { %v1199_v52 = vadd.f32 %v1163_v37, %v350_v27 }
 0x5a6   :  { %v1473_v0 = vmul.f32 -1.442695, %v1199_v52 }
 0x5a7   :  { %v1149_v33 = vpop.f32.mrf.mxu3 }
 0x5a8   :  { %1601 = vpow2.f32 %v1473_v0  ;;  %v1150_v21 = vadd.f32 %v1149_v33, %v1879_v49 }
 0x5a9   :  { %v1164_v41 = vpop.f32.mrf.mxu0 }
 0x5aa   :  { %v1179_v29 = vadd.f32 %v1150_v21, %v2168_v57  ;;  %v1177_v47 = vpop.f32.mrf.mxu1 }
 0x5ac   :  { %v1472_v10 = vmul.f32 -1.442695, %v1179_v29 }
 0x5ae   :  { %v1602_v14 = vpop.eup %1601  ;;  %1603 = vpow2.f32 %v1472_v10 }
 0x5af   :  { %v1203_v4 = vadd.f32 1.0, %v1602_v14  ;;  %v1151_v22 = vpop.f32.mrf.mxu3 }
 0x5b1   :  { %1605 = vrcp.f32 %v1203_v4  ;;  %v1215_v18 = vand.u32 2147483648, %v1203_v4  ;;  %vm1209_vm13 = vweird.f32 %v1203_v4  ;;  %v1213_v31 = vand.u32 2147483647, %v1203_v4 }
 0x5b3   :  { %v1216_v34 = vor.u32 1.1754944e-38, %v1215_v18  ;;  %vm1214_vm15 = vcmp.eq.f32.partialorder %v1213_v31, 8.507059e+37 }
 0x5b4   :  { %v1604_v1 = vpop.eup %1603 }
 0x5b5   :  { %v1183_v16 = vadd.f32 1.0, %v1604_v1 }
 0x5b7   :  { %1607 = vrcp.f32 %v1183_v16  ;;  %v1606_v13 = vpop.eup %1605  ;;  %v1195_v49 = vand.u32 2147483648, %v1183_v16  ;;  %v1193_v36 = vand.u32 2147483647, %v1183_v16  ;;  %vm1189_vm9 = vweird.f32 %v1183_v16 }
 0x5b8   :  { %v1205_v48 = vmul.f32 %v1606_v13, %v1203_v4  ;;  %vm1210_vm12 = vweird.f32 %v1606_v13 }
 0x5b9   :  { %v1196_v7 = vor.u32 1.1754944e-38, %v1195_v49  ;;  %vm1194_vm11 = vcmp.eq.f32.partialorder %v1193_v36, 8.507059e+37  ;;  %vm1211_vm14 = vmor %vm1209_vm13, %vm1210_vm12 }
 0x5ba   :  { %v1206_v53 = vsub.f32 1.0, %v1205_v48 }
 0x5bc   :  { %v1207_v5 = vmul.f32 %v1606_v13, %v1206_v53 }
 0x5bd   :  { %v1608_v51 = vpop.eup %1607 }
 0x5be   :  { %v1185_v40 = vmul.f32 %v1608_v51, %v1183_v16  ;;  %vm1190_vm8 = vweird.f32 %v1608_v51  ;;  %v1208_v44 = vadd.f32 %v1606_v13, %v1207_v5 }
 0x5bf   :  { %vm1191_vm10 = vmor %vm1189_vm9, %vm1190_vm8 }
 0x5c0   :  { %v1186_v25 = vsub.f32 1.0, %v1185_v40  ;;  %v1212_v23 = vsel %vm1211_vm14, %v1606_v13, %v1208_v44 }
 0x5c1   :  { %v1217_v45 = vsel %vm1214_vm15, %v1216_v34, %v1212_v23 }
 0x5c2   :  { %v1187_v46 = vmul.f32 %v1608_v51, %v1186_v25  ;;  %v1222_v20 = vsub.f32 1.0, %v1217_v45  ;;  %v1224_v58 = vmul.f32 %v1217_v45, %v1136_v61 }
 0x5c4   :  { %v1188_v24 = vadd.f32 %v1608_v51, %v1187_v46 }
 0x5c6   :  { %v1192_v11 = vsel %vm1191_vm10, %v1608_v51, %v1188_v24 }
 0x5c7   :  { %v1197_v28 = vsel %vm1194_vm11, %v1196_v7, %v1192_v11 }
 0x5c8   :  { %v1219_v17 = vmul.f32 %v1197_v28, %v1176_v12 }
 0x5ca   :  { %v1220_v38 = vadd.f32 %v1219_v17, %v379_v2 }
 0x5cc   :  { %1609 = vtanh.f32 %v1220_v38 }
 0x5d2   :  { %v1610_v35 = vpop.eup %1609 }
 0x5d3   :  { %v1223_v15 = vmul.f32 %v1610_v35, %v1222_v20 }
 0x5d5   :  { %v1225_v30 = vadd.f32 %v1224_v58, %v1223_v15 }
 0x5d7   :  { %1474 = vst [vmem:[%s2156_s5 + $0x38] sm:$0xff] %v1225_v30 }
 0x5d8   :  { %1232 = vst [vmem:[%s2157_s6] sm:$0xff] %v1225_v30 }
 0x5d9   :  { %1241 = vsyncpa [#allocation4], 1 }
 0x5da   :  { %1242 = vsyncpa [#allocation6], 1 }

</bundles_post_ra>
